<compile_context>
chip_gen: v6e
topology: v6e:2x2x1
jax: 0.10.0
libtpu: 0.0.40
codegen_flags: <defaults>
</compile_context>

<pallas_src>
import functools

import jax
import jax.numpy as jnp
from jax.experimental import pallas as pl
from jax.experimental.pallas import tpu as pltpu


def _mhsa_kernel(x_ref, wqkv_ref, wp_ref, bp_ref, o_ref, acc_ref, *,
                 scale, head_dim):
    # x_ref:    (C, N)      bf16   (channels on sublanes, spatial on lanes)
    # wqkv_ref: (3*hd, C)   bf16   rows = [q_h ; k_h ; v_h] of this head
    # wp_ref:   (C, hd)     bf16   W_proj[:, h*hd:(h+1)*hd]
    # bp_ref:   (1, C)      f32    proj bias
    # o_ref:    (N, C)      f32    module output rows for this batch
    # acc_ref:  (N, C)      f32    scratch accumulator over heads
    h = pl.program_id(1)

    @pl.when(h == 0)
    def _init():
        acc_ref[...] = jnp.zeros_like(acc_ref)

    x = x_ref[...]                                             # (C, N) bf16

    # Fused q/k/v projection for this head: (3*hd, C) @ (C, N) -> (3*hd, N) f32.
    qkv = jnp.dot(wqkv_ref[...], x, preferred_element_type=jnp.float32)
    q = qkv[0:head_dim].astype(jnp.bfloat16)                   # (hd, N)
    k = qkv[head_dim:2 * head_dim].astype(jnp.bfloat16)        # (hd, N)
    v = qkv[2 * head_dim:3 * head_dim].astype(jnp.bfloat16)    # (hd, N)

    # scores[nq, nk] = scale * sum_d q[d, nq] * k[d, nk]  -> (N, N) f32
    s = jax.lax.dot_general(
        q, k, dimension_numbers=(((0,), (0,)), ((), ())),
        preferred_element_type=jnp.float32) * scale

    # softmax over keys (lane axis), all f32
    m = jnp.max(s, axis=-1, keepdims=True)
    e = jnp.exp(s - m)
    p = e / jnp.sum(e, axis=-1, keepdims=True)

    # (attn @ V_h): contract over keys -> (N, hd) f32
    o_h = jax.lax.dot_general(
        p.astype(jnp.bfloat16), v,
        dimension_numbers=(((1,), (1,)), ((), ())),
        preferred_element_type=jnp.float32)

    # Head contribution to output projection: (N, hd) x (C, hd)^T -> (N, C)
    contrib = jax.lax.dot_general(
        o_h.astype(jnp.bfloat16), wp_ref[...],
        dimension_numbers=(((1,), (1,)), ((), ())),
        preferred_element_type=jnp.float32)

    acc_ref[...] += contrib

    @pl.when(h == pl.num_programs(1) - 1)
    def _finalize():
        o_ref[...] = (acc_ref[...] + bp_ref[...]).astype(o_ref.dtype)


@functools.partial(jax.jit, static_argnames=("num_heads",))
def attention_forward(x_nchw, params, *, num_heads=8):
    """Forward of Attention: x NCHW -> (B, N=H*W, C)."""
    B, C, H, W = x_nchw.shape
    N = H * W
    assert C % num_heads == 0, "dim must be divisible by num_heads"
    hd = C // num_heads
    scale = float(hd) ** -0.5          # qk_scale=None default

    # flatten(2): free reshape of contiguous NCHW -> (B, C, N). No HBM transpose.
    x_cn = x_nchw.reshape(B, C, N).astype(jnp.bfloat16)

    w_qkv = params["w_qkv"]            # (3C, C)  PyTorch Linear weight layout
    w_proj = params["w_proj"]          # (C, C)
    b_proj = params["b_proj"]          # (C,)
    # TODO(synk): qkv_bias=True support (module default is bias=False).

    # Per-head fused qkv weights: (heads, 3*hd, C), rows = [q_h ; k_h ; v_h].
    w_qkv_h = (w_qkv.reshape(3, num_heads, hd, C)
               .transpose(1, 0, 2, 3)
               .reshape(num_heads, 3 * hd, C)
               .astype(jnp.bfloat16))
    # Per-head proj column slice: (heads, C, hd), wp[h] = W_proj[:, h*hd:(h+1)*hd].
    w_proj_h = (w_proj.reshape(C, num_heads, hd)
                .transpose(1, 0, 2)
                .astype(jnp.bfloat16))
    b_proj2 = b_proj.reshape(1, C).astype(jnp.float32)

    kernel = functools.partial(_mhsa_kernel, scale=scale, head_dim=hd)

    flops = B * (2 * (3 * C) * C * N            # qkv projection
                 + num_heads * 4 * N * N * hd   # QK^T and PV
                 + 2 * N * C * C)               # output projection
    bytes_accessed = (B * C * N * 2             # x (bf16)
                      + B * (3 * C * C + C * C) * 2 + C * 4   # weights / bias
                      + B * N * C * 4)          # output (f32)

    out = pl.pallas_call(
        kernel,
        out_shape=jax.ShapeDtypeStruct((B, N, C), jnp.float32),
        grid_spec=pltpu.PrefetchScalarGridSpec(
            num_scalar_prefetch=0,
            grid=(B, num_heads),
            in_specs=[
                pl.BlockSpec((None, C, N), lambda b, h: (b, 0, 0)),       # x
                pl.BlockSpec((None, 3 * hd, C), lambda b, h: (h, 0, 0)),  # qkv W
                pl.BlockSpec((None, C, hd), lambda b, h: (h, 0, 0)),      # proj W
                pl.BlockSpec((1, C), lambda b, h: (0, 0)),                # proj b
            ],
            out_specs=pl.BlockSpec((None, N, C), lambda b, h: (b, 0, 0)),
            scratch_shapes=[pltpu.VMEM((N, C), jnp.float32)],
        ),
        compiler_params=pltpu.CompilerParams(
            dimension_semantics=("parallel", "arbitrary"),
            vmem_limit_bytes=32 * 1024 * 1024),
        cost_estimate=pl.CostEstimate(
            flops=int(flops),
            transcendentals=int(B * num_heads * N * N),
            bytes_accessed=int(bytes_accessed)),
    )(x_cn, w_qkv_h, w_proj_h, b_proj2)
    return out


def init_params(key, dim):
    """Deterministic synthetic parameters matching the module's shapes."""
    k1, k2, k3 = jax.random.split(key, 3)
    return {
        "w_qkv": jax.random.normal(k1, (3 * dim, dim), jnp.float32) * dim ** -0.5,
        "w_proj": jax.random.normal(k2, (dim, dim), jnp.float32) * dim ** -0.5,
        "b_proj": jax.random.normal(k3, (dim,), jnp.float32) * 0.02,
    }


def _reference(x_nchw, params, num_heads):
    """Plain-JAX reference mirroring the kernel's bf16-input / f32-accumulate math."""
    B, C, H, W = x_nchw.shape
    N = H * W
    hd = C // num_heads
    scale = float(hd) ** -0.5
    x = jnp.transpose(x_nchw.reshape(B, C, N), (0, 2, 1))          # (B, N, C)
    xb = x.astype(jnp.bfloat16)
    w_qkv = params["w_qkv"].astype(jnp.bfloat16)
    w_p = params["w_proj"].astype(jnp.bfloat16)
    b_p = params["b_proj"].astype(jnp.float32)

    qkv = jnp.einsum("bnc,oc->bno", xb, w_qkv,
                     preferred_element_type=jnp.float32)           # (B, N, 3C)
    qkv = qkv.reshape(B, N, 3, num_heads, hd).transpose(2, 0, 3, 1, 4)
    q, k, v = qkv[0], qkv[1], qkv[2]                               # (B, h, N, hd)
    s = jnp.einsum("bhqd,bhkd->bhqk",
                   q.astype(jnp.bfloat16), k.astype(jnp.bfloat16),
                   preferred_element_type=jnp.float32) * scale
    m = jnp.max(s, axis=-1, keepdims=True)
    e = jnp.exp(s - m)
    p = e / jnp.sum(e, axis=-1, keepdims=True)
    o = jnp.einsum("bhqk,bhkd->bhqd",
                   p.astype(jnp.bfloat16), v.astype(jnp.bfloat16),
                   preferred_element_type=jnp.float32)
    o = o.transpose(0, 2, 1, 3).reshape(B, N, C)
    out = jnp.einsum("bnd,cd->bnc", o.astype(jnp.bfloat16), w_p,
                     preferred_element_type=jnp.float32) + b_p[None, None, :]
    return out


if __name__ == "__main__":
    key = jax.random.PRNGKey(0)
    kx, kp = jax.random.split(key)

    B, dim, H, W, num_heads = 2, 128, 16, 16, 8   # dim/heads per module defaults
    x = jax.random.normal(kx, (B, dim, H, W), jnp.float32)
    params = init_params(kp, dim)

    out = attention_forward(x, params, num_heads=num_heads)
    out = jax.block_until_ready(out)

    ref = _reference(x, params, num_heads)
    assert out.shape == (B, H * W, dim)
    assert jnp.allclose(out, ref, atol=1e-2, rtol=1e-2), float(
        jnp.max(jnp.abs(out - ref)))

    print("KERNEL_OK")
</pallas_src>

<mosaic_0001>
module attributes {stable_mosaic.version = 11 : i64} {
  func.func @_mhsa_kernel(%arg0: i32, %arg1: i32, %arg2: memref<1x128x256xbf16, #tpu.memory_space<vmem>>, %arg3: memref<1x48x128xbf16, #tpu.memory_space<vmem>>, %arg4: memref<1x128x16xbf16, #tpu.memory_space<vmem>>, %arg5: memref<1x128xf32, #tpu.memory_space<vmem>>, %arg6: memref<1x256x128xf32, #tpu.memory_space<vmem>>, %arg7: memref<256x128xf32, #tpu.memory_space<vmem>>) attributes {dimension_semantics = [#tpu.dimension_semantics<parallel>, #tpu.dimension_semantics<arbitrary>], iteration_bounds = array<i64: 2, 8>, scalar_prefetch = 0 : i64, scratch_operands = 1 : i64, tpu.core_type = #tpu.core_type<tc>, window_params = [{transform_indices = @transform_0, window_bounds = array<i64: 1, 128, 256>}, {transform_indices = @transform_1, window_bounds = array<i64: 1, 48, 128>}, {transform_indices = @transform_2, window_bounds = array<i64: 1, 128, 16>}, {pipeline_mode = #tpu.pipeline_mode<synchronous>, transform_indices = @transform_3, window_bounds = array<i64: 1, 128>}, {transform_indices = @transform_4, window_bounds = array<i64: 1, 256, 128>}]} {
    %c0_i32 = arith.constant 0 : i32
    %0 = arith.cmpi eq, %arg1, %c0_i32 : i32
    %1 = arith.extui %0 : i1 to i32
    %c0_i32_0 = arith.constant 0 : i32
    %2 = arith.cmpi ne, %1, %c0_i32_0 : i32
    scf.if %2 {
      %cst_20 = arith.constant 0.000000e+00 : f32
      %38 = vector.broadcast %cst_20 : f32 to vector<256x128xf32>
      %c0_21 = arith.constant 0 : index
      %c0_22 = arith.constant 0 : index
      %39 = vector.load %arg7[%c0_21, %c0_22] : memref<256x128xf32, #tpu.memory_space<vmem>>, vector<256x128xf32>
      tpu.vector_store %arg7[%c0_21, %c0_22], %38 {strides = array<i32>} : memref<256x128xf32, #tpu.memory_space<vmem>>, vector<256x128xf32>,
    } else {
    }
    %c0 = arith.constant 0 : index
    %c0_1 = arith.constant 0 : index
    %c0_2 = arith.constant 0 : index
    %3 = vector.load %arg2[%c0, %c0_1, %c0_2] : memref<1x128x256xbf16, #tpu.memory_space<vmem>>, vector<1x128x256xbf16>
    %4 = vector.shape_cast %3 : vector<1x128x256xbf16> to vector<128x256xbf16>
    %c0_3 = arith.constant 0 : index
    %c0_4 = arith.constant 0 : index
    %c0_5 = arith.constant 0 : index
    %5 = vector.load %arg3[%c0_3, %c0_4, %c0_5] : memref<1x48x128xbf16, #tpu.memory_space<vmem>>, vector<1x48x128xbf16>
    %6 = vector.shape_cast %5 : vector<1x48x128xbf16> to vector<48x128xbf16>
    %cst = arith.constant dense<0.000000e+00> : vector<48x256xf32>
    %7 = tpu.matmul %6, %4, %cst {dimension_numbers = #tpu.dot_dimension_numbers<[1], [0], [0], [1], [0, 0, 1, 1], [], []>} : vector<48x128xbf16>, vector<128x256xbf16>, vector<48x256xf32> -> vector<48x256xf32>
    %8 = vector.extract_strided_slice %7 {offsets = [0, 0], sizes = [16, 256], strides = [1, 1]} : vector<48x256xf32> to vector<16x256xf32>
    %9 = arith.truncf %8 : vector<16x256xf32> to vector<16x256xbf16>
    %10 = vector.extract_strided_slice %7 {offsets = [16, 0], sizes = [16, 256], strides = [1, 1]} : vector<48x256xf32> to vector<16x256xf32>
    %11 = arith.truncf %10 : vector<16x256xf32> to vector<16x256xbf16>
    %12 = vector.extract_strided_slice %7 {offsets = [32, 0], sizes = [16, 256], strides = [1, 1]} : vector<48x256xf32> to vector<16x256xf32>
    %13 = arith.truncf %12 : vector<16x256xf32> to vector<16x256xbf16>
    %cst_6 = arith.constant dense<0.000000e+00> : vector<256x256xf32>
    %14 = tpu.matmul %9, %11, %cst_6 {dimension_numbers = #tpu.dot_dimension_numbers<[0], [0], [1], [1], [0, 1, 1, 1], [], []>} : vector<16x256xbf16>, vector<16x256xbf16>, vector<256x256xf32> -> vector<256x256xf32>
    %cst_7 = arith.constant 2.500000e-01 : f32
    %15 = vector.broadcast %cst_7 : f32 to vector<256x256xf32>
    %16 = arith.mulf %14, %15 : vector<256x256xf32>
    %cst_8 = arith.constant dense<0xFF800000> : vector<256xf32>
    %17 = vector.multi_reduction <maximumf>, %16, %cst_8 [1] : vector<256x256xf32> to vector<256xf32>
    %18 = vector.shape_cast %17 : vector<256xf32> to vector<256x1xf32>
    %19 = vector.broadcast %18 : vector<256x1xf32> to vector<256x256xf32>
    %20 = arith.subf %16, %19 : vector<256x256xf32>
    %21 = math.exp %20 : vector<256x256xf32>
    %cst_9 = arith.constant dense<0.000000e+00> : vector<256xf32>
    %22 = vector.multi_reduction <add>, %21, %cst_9 [1] : vector<256x256xf32> to vector<256xf32>
    %23 = vector.shape_cast %22 : vector<256xf32> to vector<256x1xf32>
    %24 = vector.broadcast %23 : vector<256x1xf32> to vector<256x256xf32>
    %25 = arith.divf %21, %24 : vector<256x256xf32>
    %26 = arith.truncf %25 : vector<256x256xf32> to vector<256x256xbf16>
    %cst_10 = arith.constant dense<0.000000e+00> : vector<256x16xf32>
    %27 = tpu.matmul %26, %13, %cst_10 {dimension_numbers = #tpu.dot_dimension_numbers<[1], [1], [0], [0], [0, 0, 1, 0], [], []>} : vector<256x256xbf16>, vector<16x256xbf16>, vector<256x16xf32> -> vector<256x16xf32>
    %28 = arith.truncf %27 : vector<256x16xf32> to vector<256x16xbf16>
    %c0_11 = arith.constant 0 : index
    %c0_12 = arith.constant 0 : index
    %c0_13 = arith.constant 0 : index
    %29 = vector.load %arg4[%c0_11, %c0_12, %c0_13] : memref<1x128x16xbf16, #tpu.memory_space<vmem>>, vector<1x128x16xbf16>
    %30 = vector.shape_cast %29 : vector<1x128x16xbf16> to vector<128x16xbf16>
    %cst_14 = arith.constant dense<0.000000e+00> : vector<256x128xf32>
    %31 = tpu.matmul %28, %30, %cst_14 {dimension_numbers = #tpu.dot_dimension_numbers<[1], [1], [0], [0], [0, 0, 1, 0], [], []>} : vector<256x16xbf16>, vector<128x16xbf16>, vector<256x128xf32> -> vector<256x128xf32>
    %c0_15 = arith.constant 0 : index
    %c0_16 = arith.constant 0 : index
    %32 = vector.load %arg7[%c0_15, %c0_16] : memref<256x128xf32, #tpu.memory_space<vmem>>, vector<256x128xf32>
    %33 = arith.addf %32, %31 : vector<256x128xf32>
    %c0_17 = arith.constant 0 : index
    %c0_18 = arith.constant 0 : index
    %34 = vector.load %arg7[%c0_17, %c0_18] : memref<256x128xf32, #tpu.memory_space<vmem>>, vector<256x128xf32>
    tpu.vector_store %arg7[%c0_17, %c0_18], %33 {strides = array<i32>} : memref<256x128xf32, #tpu.memory_space<vmem>>, vector<256x128xf32>,
    %c7_i32 = arith.constant 7 : i32
    %35 = arith.cmpi eq, %arg1, %c7_i32 : i32
    %36 = arith.extui %35 : i1 to i32
    %c0_i32_19 = arith.constant 0 : i32
    %37 = arith.cmpi ne, %36, %c0_i32_19 : i32
    scf.if %37 {
      %c0_20 = arith.constant 0 : index
      %c0_21 = arith.constant 0 : index
      %38 = vector.load %arg7[%c0_20, %c0_21] : memref<256x128xf32, #tpu.memory_space<vmem>>, vector<256x128xf32>
      %c0_22 = arith.constant 0 : index
      %c0_23 = arith.constant 0 : index
      %39 = vector.load %arg5[%c0_22, %c0_23] : memref<1x128xf32, #tpu.memory_space<vmem>>, vector<1x128xf32>
      %40 = vector.broadcast %39 : vector<1x128xf32> to vector<256x128xf32>
      %41 = arith.addf %38, %40 : vector<256x128xf32>
      %c0_24 = arith.constant 0 : index
      %c0_25 = arith.constant 0 : index
      %c0_26 = arith.constant 0 : index
      %42 = vector.load %arg6[%c0_24, %c0_25, %c0_26] : memref<1x256x128xf32, #tpu.memory_space<vmem>>, vector<1x256x128xf32>
      %43 = vector.shape_cast %42 : vector<1x256x128xf32> to vector<256x128xf32>
      %44 = vector.shape_cast %41 : vector<256x128xf32> to vector<1x256x128xf32>
      tpu.vector_store %arg6[%c0_24, %c0_25, %c0_26], %44 {strides = array<i32>} : memref<1x256x128xf32, #tpu.memory_space<vmem>>, vector<1x256x128xf32>,
    } else {
    }
    return
  }
  func.func @transform_0(%arg0: i32, %arg1: i32) -> (i32, i32, i32) {
    %c0_i32 = arith.constant 0 : i32
    %c0_i32_0 = arith.constant 0 : i32
    %c0_i32_1 = arith.constant 0 : i32
    return %arg0, %c0_i32, %c0_i32_0 : i32, i32, i32
  }
  func.func @transform_1(%arg0: i32, %arg1: i32) -> (i32, i32, i32) {
    %c0_i32 = arith.constant 0 : i32
    %c0_i32_0 = arith.constant 0 : i32
    %c0_i32_1 = arith.constant 0 : i32
    return %arg1, %c0_i32, %c0_i32_0 : i32, i32, i32
  }
  func.func @transform_2(%arg0: i32, %arg1: i32) -> (i32, i32, i32) {
    %c0_i32 = arith.constant 0 : i32
    %c0_i32_0 = arith.constant 0 : i32
    %c0_i32_1 = arith.constant 0 : i32
    return %arg1, %c0_i32, %c0_i32_0 : i32, i32, i32
  }
  func.func @transform_3(%arg0: i32, %arg1: i32) -> (i32, i32) {
    %c0_i32 = arith.constant 0 : i32
    %c0_i32_0 = arith.constant 0 : i32
    %c0_i32_1 = arith.constant 0 : i32
    return %c0_i32, %c0_i32_0 : i32, i32
  }
  func.func @transform_4(%arg0: i32, %arg1: i32) -> (i32, i32, i32) {
    %c0_i32 = arith.constant 0 : i32
    %c0_i32_0 = arith.constant 0 : i32
    %c0_i32_1 = arith.constant 0 : i32
    return %arg0, %c0_i32, %c0_i32_0 : i32, i32, i32
  }
}

</mosaic_0001>

<bundles_post_ra>
// kernel: attention_forward.1
= control target key start
LH: loop header
LB: loop body
LE: loop exit
PB: predicated region body
PF: predicated region fallthrough
CT: control target
= control target key end

     0   :  { %9 = vsyncpa [#allocation4], 0  ;;  %s3533_s0 = inlined_call_operand.vmem [shape: bf16[2,128,256], index: 0, kind: input, shape index: {}]   ;;  %s3534_s1 = inlined_call_operand.vmem [shape: bf16[8,48,128], index: 1, kind: input, shape index: {}]   ;;  %s3535_s2 = inlined_call_operand.vmem [shape: bf16[8,128,16], index: 2, kind: input, shape index: {}]   ;;  %s3536_s3 = inlined_call_operand.vmem [shape: f32[1,128], index: 3, kind: input, shape index: {}]   ;;  %s3537_s4 = inlined_call_operand.hbm [shape: f32[2,256,128], index: 4, kind: output, shape index: {}]  }
   0x1   :  { %11 = vsyncpa [#allocation4 + $0x1], 0  ;;  %s2692_s15 = smov 0   ;;  %s2694_s16 = smov 0  }
   0x2   :  { %s2696_s17 = smov 0   ;;  %s2698_s18 = smov 0  }
   0x3   :  { %s2700_s19 = smov 0   ;;  %s2702_s20 = smov 0  }
   0x4   :  { %s2704_s21 = smov 0   ;;  %s2706_s22 = smov 0  }
   0x5 LB: > { %3556 = sst [smem:[#allocation6_spill]] %s2656_s21  ;;  %s2104_s23 = sadd.s32 4294967295, %s2660_s22   ;;  %s2660_s22 = sphi %s2706_s22, %s17_s22   ;;  %s2656_s21 = sphi %s2704_s21, %s3594_s21   ;;  %s2652_s20 = sphi %s2702_s20, %s3599_s20   ;;  %s2648_s19 = sphi %s2700_s19, %s3592_s19   ;;  %s2644_s18 = sphi %s2698_s18, %s3598_s18   ;;  %s2640_s17 = sphi %s2696_s17, %s3597_s17   ;;  %s2636_s16 = sphi %s2694_s16, %s3596_s16   ;;  %s2632_s15 = sphi %s2692_s15, %s3595_s15  }
   0x6   : > { %s2105_s24 = sadd.s32 4294967294, %s2660_s22   ;;  %s26_s25 = sadd.s32 1, %s2652_s20 }
   0x7   : > { %p27_p0 = scmp.ge.s32.totalorder %s26_s25, 8  ;;  %s29_s26 = sadd.s32 1, %s2656_s21 }
   0x8   : > { %p145_p1 = scmp.ne.s32.totalorder %s2640_s17, %s2636_s16  ;;  %p146_p2 = scmp.eq.s32.totalorder %s2104_s23, 15 }
   0x9   : > { %s3601_s25 = smov (%p27_p0, %s26_s25), 0  ;;  %s3603_s26 = smov (!%p27_p0, %s29_s26), %s2656_s21 }
   0xa   : > { %3557 = sst [smem:[#allocation7_spill]] %s3601_s25  ;;  %p2741_p3 = por %p146_p2, %p145_p1 }
   0xb   : > { %p151_p4 = scmp.ne.s32.totalorder %s2636_s16, %s2632_s15  ;;  %p31_p5 = scmp.ge.s32.totalorder %s3603_s26, 2 }
   0xc   : > { %p152_p6 = scmp.eq.s32.totalorder %s2105_s24, 15  ;;  %p2108_p7 = scmp.ge.s32.totalorder %s2660_s22, 1 }
   0xd   : > { %p197_p8 = scmp.lt.s32.totalorder %s2660_s22, 17  ;;  %s3605_s26 = smov (%p31_p5, %s3603_s26), 0 }
   0xe   : > { %3559 = sst [smem:[#allocation8_spill]] %s3605_s26  ;;  %p2751_p9 = por %p152_p6, %p151_p4 }
   0xf   : > { %p198_p10 = pnand %p2108_p7, %p197_p8  ;;  %s132_s29 = ssub.s32 %s2656_s21, %s3605_s26 }
  0x10   : > { %s135_s30 = sadd.s32 1, %s2640_s17  ;;  %p133_p11 = scmp.eq.s32.totalorder %s132_s29, 0 }
  0x11   : > { %201 = sbr.rel (%p198_p10) target bundleno = 1535 (0x5ff), region = 36 }
  0x12   : > { %s2759_s5 = scalar_select %p133_p11, %s2640_s17, %s135_s30  }
  0x16   : > { %s3539_s6 = sand.u32 1, %s2636_s16   ;;  %p233_p12 = scmp.lt.s32.totalorder %s2648_s19, 1 }
  0x17   : > { %s2109_s7 = sshll.u32 %s3539_s6, 8  ;;  %p238_p13 = scmp.lt.s32.totalorder %s2644_s18, 7 }
  0x18   : > { %s234_s8 = scalar_select %p233_p12, %s2648_s19, 1 }
  0x19   : > { %s239_s9 = scalar_select %p238_p13, %s2644_s18, 7 }
  0x1a   : > { %s2182_s10 = sshll.u32 %s234_s8, 7  ;;  %s2783_s21 = scalar_lea.vmem [#allocation3], %s2109_s7 }
  0x1b   : > { %s2771_s13 = scalar_lea.vmem %s3533_s0, %s2182_s10  ;;  %s2265_s14 = smul.u32 24, %s239_s9 }
  0x1c   : > { %s2183_s23 = sshll.u32 %s239_s9, 6  ;;  %p2115_p0 = scmp.ne.s32.totalorder %s2644_s18, 0 }
  0x1d   : > { %s2776_s30 = scalar_lea.vmem %s3534_s1, %s2265_s14  ;;  %s2781_s6 = scalar_lea.vmem %s3535_s2, %s2183_s23 }
  0x1e   : > { %252 = sbr.rel (%p2115_p0) target bundleno = 52 (0x34), region = 40 }
  0x23   : > { %v2662_v0 = vmov 0.0  }
  0x24   : > { %253 = vst [vmem:[#allocation2 + $0xb0] sm:$0xff] %v2662_v0  ;;  %254 = vst [vmem:[#allocation2] sm:$0xff] %v2662_v0 }
  0x25   : > { %255 = vst [vmem:[#allocation2 + $0xd8] sm:$0xff] %v2662_v0  ;;  %256 = vst [vmem:[#allocation2 + $0x18] sm:$0xff] %v2662_v0 }
  0x26   : > { %257 = vst [vmem:[#allocation2 + $0x50] sm:$0xff] %v2662_v0  ;;  %258 = vst [vmem:[#allocation2 + $0x68] sm:$0xff] %v2662_v0 }
  0x27   : > { %259 = vst [vmem:[#allocation2 + $0x30] sm:$0xff] %v2662_v0  ;;  %260 = vst [vmem:[#allocation2 + $0x48] sm:$0xff] %v2662_v0 }
  0x28   : > { %261 = vst [vmem:[#allocation2 + $0x80] sm:$0xff] %v2662_v0  ;;  %262 = vst [vmem:[#allocation2 + $0x88] sm:$0xff] %v2662_v0 }
  0x29   : > { %263 = vst [vmem:[#allocation2 + $0xe8] sm:$0xff] %v2662_v0  ;;  %264 = vst [vmem:[#allocation2 + $0xb8] sm:$0xff] %v2662_v0 }
  0x2a   : > { %265 = vst [vmem:[#allocation2 + $0x60] sm:$0xff] %v2662_v0  ;;  %266 = vst [vmem:[#allocation2 + $0xf0] sm:$0xff] %v2662_v0 }
  0x2b   : > { %267 = vst [vmem:[#allocation2 + $0x8] sm:$0xff] %v2662_v0  ;;  %268 = vst [vmem:[#allocation2 + $0x78] sm:$0xff] %v2662_v0 }
  0x2c   : > { %269 = vst [vmem:[#allocation2 + $0x38] sm:$0xff] %v2662_v0  ;;  %270 = vst [vmem:[#allocation2 + $0x58] sm:$0xff] %v2662_v0 }
  0x2d   : > { %271 = vst [vmem:[#allocation2 + $0x40] sm:$0xff] %v2662_v0  ;;  %272 = vst [vmem:[#allocation2 + $0xc8] sm:$0xff] %v2662_v0 }
  0x2e   : > { %273 = vst [vmem:[#allocation2 + $0xe0] sm:$0xff] %v2662_v0  ;;  %274 = vst [vmem:[#allocation2 + $0x90] sm:$0xff] %v2662_v0 }
  0x2f   : > { %275 = vst [vmem:[#allocation2 + $0x70] sm:$0xff] %v2662_v0  ;;  %276 = vst [vmem:[#allocation2 + $0xc0] sm:$0xff] %v2662_v0 }
  0x30   : > { %277 = vst [vmem:[#allocation2 + $0xa8] sm:$0xff] %v2662_v0  ;;  %278 = vst [vmem:[#allocation2 + $0xd0] sm:$0xff] %v2662_v0 }
  0x31   : > { %279 = vst [vmem:[#allocation2 + $0x10] sm:$0xff] %v2662_v0  ;;  %280 = vst [vmem:[#allocation2 + $0x28] sm:$0xff] %v2662_v0 }
  0x32   : > { %281 = vst [vmem:[#allocation2 + $0xa0] sm:$0xff] %v2662_v0  ;;  %282 = vst [vmem:[#allocation2 + $0xf8] sm:$0xff] %v2662_v0 }
  0x33   : > { %283 = vst [vmem:[#allocation2 + $0x20] sm:$0xff] %v2662_v0  ;;  %284 = vst [vmem:[#allocation2 + $0x98] sm:$0xff] %v2662_v0 }
  0x34 PF: > { %v2341_v1 = vld [vmem:[%s2771_s13 + $0x74] ss:$8 sps:$4 sm:$0xff]   ;;  %v2343_v2 = vld [vmem:[%s2771_s13 + $0x70] ss:$8 sps:$4 sm:$0xff]   ;;  %v2663_v3 = vmov 0   ;;  %v2365_v18 = vld [vmem:[%s2776_s30] sm:$0xff]  }
  0x35   : > { %437 = vmatprep.mubr.bf16.mxu0 %v2663_v3  ;;  %587 = vmatprep.mubr.bf16.mxu1 %v2663_v3  ;;  %v2344_v4 = vld [vmem:[%s2771_s13 + $0x64] ss:$8 sps:$4 sm:$0xff]   ;;  %v2346_v5 = vld [vmem:[%s2771_s13 + $0x60] ss:$8 sps:$4 sm:$0xff]   ;;  %v2347_v6 = vld [vmem:[%s2771_s13 + $0x54] ss:$8 sps:$4 sm:$0xff]  }
  0x36   : > { %405 = vmatprep.subr.bf16.mxu0 %v2341_v1  ;;  %v2349_v7 = vld [vmem:[%s2771_s13 + $0x50] ss:$8 sps:$4 sm:$0xff]   ;;  %v2350_v8 = vld [vmem:[%s2771_s13 + $0x44] ss:$8 sps:$4 sm:$0xff]   ;;  %v2352_v9 = vld [vmem:[%s2771_s13 + $0x40] ss:$8 sps:$4 sm:$0xff]  }
  0x37   : > { %406 = vmatpush1.bf16.msra.mxu0 %v2343_v2  ;;  %v2353_v10 = vld [vmem:[%s2771_s13 + $0x34] ss:$8 sps:$4 sm:$0xff]   ;;  %v2355_v11 = vld [vmem:[%s2771_s13 + $0x30] ss:$8 sps:$4 sm:$0xff]   ;;  %v2356_v12 = vld [vmem:[%s2771_s13 + $0x24] ss:$8 sps:$4 sm:$0xff]  }
  0x38   : > { %407 = vmatprep.subr.bf16.mxu0 %v2344_v4  ;;  %v2358_v13 = vld [vmem:[%s2771_s13 + $0x20] ss:$8 sps:$4 sm:$0xff]   ;;  %v2359_v14 = vld [vmem:[%s2771_s13 + $0x14] ss:$8 sps:$4 sm:$0xff]   ;;  %v2361_v15 = vld [vmem:[%s2771_s13 + $0x10] ss:$8 sps:$4 sm:$0xff]  }
  0x39   : > { %v2362_v16 = vld [vmem:[%s2771_s13 + $0x4] ss:$8 sps:$4 sm:$0xff]   ;;  %v2364_v17 = vld [vmem:[%s2771_s13] ss:$8 sps:$4 sm:$0xff]   ;;  %vm506_vm0 = vcmask 130048   ;;  %v2367_v48 = vld [vmem:[%s2776_s30 + $0x10] sm:$0xff]  }
  0x3a   : > { %v2366_v19 = vld [vmem:[%s2776_s30 + $0x8] sm:$0xff]   ;;  %p2175_p1 = scmp.ne.s32.totalorder %s2644_s18, 7 }
  0x3b   : > { %408 = vmatpush1.bf16.msra.mxu0 %v2346_v5 }
  0x3c   : > { %409 = vmatprep.subr.bf16.mxu0 %v2347_v6 }
  0x3f   : > { %410 = vmatpush1.bf16.msra.mxu0 %v2349_v7 }
  0x40   : > { %411 = vmatprep.subr.bf16.mxu0 %v2350_v8 }
  0x43   : > { %412 = vmatpush1.bf16.msra.mxu0 %v2352_v9 }
  0x44   : > { %413 = vmatprep.subr.bf16.mxu0 %v2353_v10 }
  0x47   : > { %414 = vmatpush1.bf16.msra.mxu0 %v2355_v11 }
  0x48   : > { %415 = vmatprep.subr.bf16.mxu0 %v2356_v12 }
  0x4b   : > { %416 = vmatpush1.bf16.msra.mxu0 %v2358_v13 }
  0x4c   : > { %417 = vmatprep.subr.bf16.mxu0 %v2359_v14 }
  0x4f   : > { %418 = vmatpush1.bf16.msra.mxu0 %v2361_v15 }
  0x50   : > { %419 = vmatprep.subr.bf16.mxu0 %v2362_v16 }
  0x53   : > { %420 = vmatpush1.bf16.msra.mxu0 %v2364_v17 }
  0x56   : > { %438 = vmatmul.mubr.bf16.vlgmr.msra.gmra.mxu0 %v2365_v18 }
  0x57   : > { %447 = vmatprep.mubr.bf16.mxu0 %v2663_v3 }
  0x5e   : > { %448 = vmatmul.mubr.bf16.gmra.mxu0 %v2366_v19 }
  0x5f   : > { %457 = vmatprep.mubr.bf16.mxu0 %v2663_v3 }
  0x66   : > { %458 = vmatmul.mubr.bf16.gmra.mxu0 %v2367_v48 }
 0x116   : > { %v439_v20 = vpop.f32.mrf.mxu0 }
 0x118   : > { %v441_v21 = vpop.f32.mrf.mxu0 }
 0x11a   : > { %v443_v22 = vpop.f32.mrf.mxu0 }
 0x11b   : > { %v468_v23 = vpack.c.bf16 %v443_v22, %v439_v20 }
 0x11c   : > { %v445_v24 = vpop.f32.mrf.mxu0 }
 0x11d   : > { %474 = vxpose.xlu0.c.b16.start.end [1/1] (short) %v468_v23, 128  ;;  %v469_v31 = vpack.c.bf16 %v445_v24, %v441_v21 }
 0x11e   : > { %v449_v25 = vpop.f32.mrf.mxu0 }
 0x120   : > { %v451_v26 = vpop.f32.mrf.mxu0 }
 0x122   : > { %v453_v27 = vpop.f32.mrf.mxu0 }
 0x123   : > { %v470_v28 = vpack.c.bf16 %v453_v27, %v449_v25 }
 0x124   : > { %v455_v29 = vpop.f32.mrf.mxu0 }
 0x125   : > { %v471_v30 = vpack.c.bf16 %v455_v29, %v451_v26 }
 0x127   : > { %569 = vmatprep.subr.bf16.mxu1 %v471_v30 }
 0x128   : > { %570 = vmatpush1.bf16.msra.mxu1 %v470_v28 }
 0x13a   : > { %490 = vxpose.xlu0.c.b16.start.end [1/1] (short) %v469_v31, 128 }
 0x17f   : > { %v482_v32 = vpop.trf.xlu0 }
 0x180   : > { %2135 = vmatmul.mubr.msk.bf16.vlgmr.msra.gmra.mxu1 %vm506_vm0, %v482_v32 }
 0x181   : > { %597 = vmatprep.mubr.bf16.mxu1 %v2663_v3 }
 0x183   : > { %v483_v33 = vpop.trf.xlu0 }
 0x187   : > { %v484_v34 = vpop.trf.xlu0 }
 0x188   : > { %2136 = vmatmul.mubr.msk.bf16.gmra.mxu1 %vm506_vm0, %v483_v33 }
 0x189   : > { %607 = vmatprep.mubr.bf16.mxu1 %v2663_v3 }
 0x18b   : > { %v485_v35 = vpop.trf.xlu0 }
 0x18f   : > { %v486_v36 = vpop.trf.xlu0 }
 0x190   : > { %2137 = vmatmul.mubr.msk.bf16.gmra.mxu1 %vm506_vm0, %v484_v34 }
 0x191   : > { %617 = vmatprep.mubr.bf16.mxu1 %v2663_v3 }
 0x193   : > { %v487_v37 = vpop.trf.xlu0 }
 0x197   : > { %v488_v38 = vpop.trf.xlu0 }
 0x198   : > { %2138 = vmatmul.mubr.msk.bf16.gmra.mxu1 %vm506_vm0, %v485_v35 }
 0x199   : > { %627 = vmatprep.mubr.bf16.mxu1 %v2663_v3 }
 0x19b   : > { %v489_v39 = vpop.trf.xlu0 }
 0x19f   : > { %v498_v40 = vpop.trf.xlu0 }
 0x1a0   : > { %2139 = vmatmul.mubr.msk.bf16.gmra.mxu1 %vm506_vm0, %v486_v36 }
 0x1a1   : > { %637 = vmatprep.mubr.bf16.mxu1 %v2663_v3 }
 0x1a3   : > { %v499_v41 = vpop.trf.xlu0 }
 0x1a7   : > { %v500_v42 = vpop.trf.xlu0 }
 0x1a8   : > { %2140 = vmatmul.mubr.msk.bf16.gmra.mxu1 %vm506_vm0, %v487_v37 }
 0x1a9   : > { %647 = vmatprep.mubr.bf16.mxu1 %v2663_v3 }
 0x1ab   : > { %v501_v43 = vpop.trf.xlu0 }
 0x1af   : > { %v502_v44 = vpop.trf.xlu0 }
 0x1b0   : > { %2141 = vmatmul.mubr.msk.bf16.gmra.mxu1 %vm506_vm0, %v488_v38 }
 0x1b1   : > { %657 = vmatprep.mubr.bf16.mxu1 %v2663_v3 }
 0x1b3   : > { %v503_v45 = vpop.trf.xlu0 }
 0x1b7   : > { %v504_v46 = vpop.trf.xlu0 }
 0x1b8   : > { %2142 = vmatmul.mubr.msk.bf16.gmra.mxu1 %vm506_vm0, %v489_v39 }
 0x1b9   : > { %667 = vmatprep.mubr.bf16.mxu1 %v2663_v3 }
 0x1bb   : > { %v505_v47 = vpop.trf.xlu0 }
 0x1c0   : > { %2143 = vmatmul.mubr.msk.bf16.gmra.mxu1 %vm506_vm0, %v498_v40 }
 0x1c1   : > { %677 = vmatprep.mubr.bf16.mxu1 %v2663_v3 }
 0x1c8   : > { %2144 = vmatmul.mubr.msk.bf16.gmra.mxu1 %vm506_vm0, %v499_v41 }
 0x1c9   : > { %687 = vmatprep.mubr.bf16.mxu1 %v2663_v3 }
 0x1d0   : > { %2145 = vmatmul.mubr.msk.bf16.gmra.mxu1 %vm506_vm0, %v500_v42 }
 0x1d1   : > { %697 = vmatprep.mubr.bf16.mxu1 %v2663_v3 }
 0x1d8   : > { %2146 = vmatmul.mubr.msk.bf16.gmra.mxu1 %vm506_vm0, %v501_v43 }
 0x1d9   : > { %707 = vmatprep.mubr.bf16.mxu1 %v2663_v3 }
 0x1e0   : > { %2147 = vmatmul.mubr.msk.bf16.gmra.mxu1 %vm506_vm0, %v502_v44 }
 0x1e1   : > { %717 = vmatprep.mubr.bf16.mxu1 %v2663_v3 }
 0x1e8   : > { %2148 = vmatmul.mubr.msk.bf16.gmra.mxu1 %vm506_vm0, %v503_v45 }
 0x1e9   : > { %727 = vmatprep.mubr.bf16.mxu1 %v2663_v3 }
 0x1f0   : > { %2149 = vmatmul.mubr.msk.bf16.gmra.mxu1 %vm506_vm0, %v504_v46 }
 0x1f1   : > { %737 = vmatprep.mubr.bf16.mxu1 %v2663_v3 }
 0x1f8   : > { %2150 = vmatmul.mubr.msk.bf16.gmra.mxu1 %vm506_vm0, %v505_v47 }
 0x240   : > { %v589_v49 = vpop.f32.mrf.mxu1 }
 0x241   : > { %v2840_v51 = vmul.f32 0.25, %v589_v49 }
 0x242   : > { %v591_v50 = vpop.f32.mrf.mxu1 }
 0x243   : > { %v2842_v52 = vmul.f32 0.25, %v591_v50 }
 0x244   : > { %v593_v53 = vpop.f32.mrf.mxu1 }
 0x245   : > { %v812_v54 = vmax.f32 %v2840_v51, %v2842_v52  ;;  %v2846_v56 = vmul.f32 0.25, %v593_v53 }
 0x246   : > { %v595_v55 = vpop.f32.mrf.mxu1 }
 0x247   : > { %v2848_v57 = vmul.f32 0.25, %v595_v55  ;;  %813 = vmax.xlane.f32.xlu1 %v812_v54 }
 0x248   : > { %v599_v58 = vpop.f32.mrf.mxu1 }
 0x249   : > { %v815_v59 = vmax.f32 %v2846_v56, %v2848_v57  ;;  %v2852_v61 = vmul.f32 0.25, %v599_v58 }
 0x24a   : > { %v601_v60 = vpop.f32.mrf.mxu1 }
 0x24b   : > { %v2854_v62 = vmul.f32 0.25, %v601_v60  ;;  %816 = vmax.xlane.f32.xlu1 %v815_v59 }
 0x24c   : > { %v603_v63 = vpop.f32.mrf.mxu1 }
 0x24d   : > { %v818_v0 = vmax.f32 %v2852_v61, %v2854_v62  ;;  %v2858_v2 = vmul.f32 0.25, %v603_v63 }
 0x24e   : > { %v605_v1 = vpop.f32.mrf.mxu1 }
 0x24f   : > { %v2860_v3 = vmul.f32 0.25, %v605_v1  ;;  %819 = vmax.xlane.f32.xlu1 %v818_v0 }
 0x250   : > { %v609_v4 = vpop.f32.mrf.mxu1 }
 0x251   : > { %v821_v5 = vmax.f32 %v2858_v2, %v2860_v3  ;;  %v2864_v7 = vmul.f32 0.25, %v609_v4 }
 0x252   : > { %v611_v6 = vpop.f32.mrf.mxu1 }
 0x253   : > { %v2866_v8 = vmul.f32 0.25, %v611_v6  ;;  %822 = vmax.xlane.f32.xlu1 %v821_v5 }
 0x254   : > { %v613_v9 = vpop.f32.mrf.mxu1 }
 0x255   : > { %v824_v10 = vmax.f32 %v2864_v7, %v2866_v8  ;;  %v2870_v12 = vmul.f32 0.25, %v613_v9 }
 0x256   : > { %v615_v11 = vpop.f32.mrf.mxu1 }
 0x257   : > { %v2872_v13 = vmul.f32 0.25, %v615_v11  ;;  %825 = vmax.xlane.f32.xlu1 %v824_v10 }
 0x258   : > { %v619_v14 = vpop.f32.mrf.mxu1 }
 0x259   : > { %v827_v15 = vmax.f32 %v2870_v12, %v2872_v13  ;;  %v2876_v17 = vmul.f32 0.25, %v619_v14 }
 0x25a   : > { %v621_v16 = vpop.f32.mrf.mxu1 }
 0x25b   : > { %v2878_v18 = vmul.f32 0.25, %v621_v16  ;;  %828 = vmax.xlane.f32.xlu1 %v827_v15 }
 0x25c   : > { %v623_v19 = vpop.f32.mrf.mxu1 }
 0x25d   : > { %v830_v20 = vmax.f32 %v2876_v17, %v2878_v18  ;;  %v2882_v22 = vmul.f32 0.25, %v623_v19 }
 0x25e   : > { %v625_v21 = vpop.f32.mrf.mxu1 }
 0x25f   : > { %v2884_v23 = vmul.f32 0.25, %v625_v21  ;;  %831 = vmax.xlane.f32.xlu1 %v830_v20 }
 0x260   : > { %v629_v24 = vpop.f32.mrf.mxu1 }
 0x261   : > { %v2886_v25 = vmul.f32 0.25, %v629_v24  ;;  %v833_v26 = vmax.f32 %v2882_v22, %v2884_v23 }
 0x262   : > { %v631_v27 = vpop.f32.mrf.mxu1 }
 0x263   : > { %v2890_v28 = vmul.f32 0.25, %v631_v27  ;;  %834 = vmax.xlane.f32.xlu1 %v833_v26 }
 0x264   : > { %v633_v29 = vpop.f32.mrf.mxu1 }
 0x265   : > { %v2892_v30 = vmul.f32 0.25, %v633_v29  ;;  %v836_v31 = vmax.f32 %v2886_v25, %v2890_v28 }
 0x266   : > { %v635_v32 = vpop.f32.mrf.mxu1 }
 0x267   : > { %v2896_v33 = vmul.f32 0.25, %v635_v32  ;;  %837 = vmax.xlane.f32.xlu1 %v836_v31 }
 0x268   : > { %v639_v34 = vpop.f32.mrf.mxu1 }
 0x269   : > { %v2898_v35 = vmul.f32 0.25, %v639_v34  ;;  %v839_v36 = vmax.f32 %v2892_v30, %v2896_v33 }
 0x26a   : > { %v641_v37 = vpop.f32.mrf.mxu1 }
 0x26b   : > { %v2902_v38 = vmul.f32 0.25, %v641_v37  ;;  %840 = vmax.xlane.f32.xlu0 %v839_v36 }
 0x26c   : > { %v643_v39 = vpop.f32.mrf.mxu1 }
 0x26d   : > { %v2904_v40 = vmul.f32 0.25, %v643_v39  ;;  %v842_v41 = vmax.f32 %v2898_v35, %v2902_v38 }
 0x26e   : > { %v645_v42 = vpop.f32.mrf.mxu1 }
 0x26f   : > { %v2908_v43 = vmul.f32 0.25, %v645_v42  ;;  %843 = vmax.xlane.f32.xlu1 %v842_v41 }
 0x270   : > { %v649_v44 = vpop.f32.mrf.mxu1 }
 0x271   : > { %v2910_v45 = vmul.f32 0.25, %v649_v44  ;;  %v845_v46 = vmax.f32 %v2904_v40, %v2908_v43 }
 0x272   : > { %v651_v47 = vpop.f32.mrf.mxu1 }
 0x273   : > { %v2914_v48 = vmul.f32 0.25, %v651_v47  ;;  %846 = vmax.xlane.f32.xlu1 %v845_v46 }
 0x274   : > { %v653_v49 = vpop.f32.mrf.mxu1 }
 0x275   : > { %v2916_v50 = vmul.f32 0.25, %v653_v49  ;;  %v848_v53 = vmax.f32 %v2910_v45, %v2914_v48 }
 0x276   : > { %v655_v54 = vpop.f32.mrf.mxu1 }
 0x277   : > { %v2920_v55 = vmul.f32 0.25, %v655_v54  ;;  %849 = vmax.xlane.f32.xlu1 %v848_v53 }
 0x278   : > { %v659_v58 = vpop.f32.mrf.mxu1 }
 0x279   : > { %v2922_v59 = vmul.f32 0.25, %v659_v58  ;;  %v851_v60 = vmax.f32 %v2916_v50, %v2920_v55 }
 0x27a   : > { %v661_v63 = vpop.f32.mrf.mxu1 }
 0x27b   : > { %v2926_v0 = vmul.f32 0.25, %v661_v63  ;;  %852 = vmax.xlane.f32.xlu1 %v851_v60 }
 0x27c   : > { %v663_v1 = vpop.f32.mrf.mxu1 }
 0x27d   : > { %v2928_v4 = vmul.f32 0.25, %v663_v1  ;;  %v854_v5 = vmax.f32 %v2922_v59, %v2926_v0 }
 0x27e   : > { %v665_v6 = vpop.f32.mrf.mxu1 }
 0x27f   : > { %v2932_v9 = vmul.f32 0.25, %v665_v6  ;;  %855 = vmax.xlane.f32.xlu1 %v854_v5 }
 0x280   : > { %v669_v10 = vpop.f32.mrf.mxu1 }
 0x281   : > { %v2934_v11 = vmul.f32 0.25, %v669_v10  ;;  %v857_v14 = vmax.f32 %v2928_v4, %v2932_v9 }
 0x282   : > { %v671_v15 = vpop.f32.mrf.mxu1 }
 0x283   : > { %v2938_v16 = vmul.f32 0.25, %v671_v15  ;;  %858 = vmax.xlane.f32.xlu1 %v857_v14 }
 0x284   : > { %v673_v19 = vpop.f32.mrf.mxu1 }
 0x285   : > { %v2940_v20 = vmul.f32 0.25, %v673_v19  ;;  %v860_v21 = vmax.f32 %v2934_v11, %v2938_v16 }
 0x286   : > { %v675_v24 = vpop.f32.mrf.mxu1 }
 0x287   : > { %v2944_v26 = vmul.f32 0.25, %v675_v24  ;;  %861 = vmax.xlane.f32.xlu1 %v860_v21 }
 0x288   : > { %v679_v27 = vpop.f32.mrf.mxu1 }
 0x289   : > { %v2946_v29 = vmul.f32 0.25, %v679_v27  ;;  %v863_v31 = vmax.f32 %v2940_v20, %v2944_v26 }
 0x28a   : > { %v681_v32 = vpop.f32.mrf.mxu1 }
 0x28b   : > { %v2950_v34 = vmul.f32 0.25, %v681_v32  ;;  %864 = vmax.xlane.f32.xlu1 %v863_v31 }
 0x28c   : > { %v683_v36 = vpop.f32.mrf.mxu1 }
 0x28d   : > { %v2952_v37 = vmul.f32 0.25, %v683_v36  ;;  %v866_v39 = vmax.f32 %v2946_v29, %v2950_v34 }
 0x28e   : > { %v685_v41 = vpop.f32.mrf.mxu1 }
 0x28f   : > { %v2956_v42 = vmul.f32 0.25, %v685_v41  ;;  %867 = vmax.xlane.f32.xlu1 %v866_v39 }
 0x290   : > { %v689_v44 = vpop.f32.mrf.mxu1 }
 0x291   : > { %v2958_v46 = vmul.f32 0.25, %v689_v44  ;;  %v869_v47 = vmax.f32 %v2952_v37, %v2956_v42 }
 0x292   : > { %v691_v49 = vpop.f32.mrf.mxu1 }
 0x293   : > { %v2962_v53 = vmul.f32 0.25, %v691_v49  ;;  %870 = vmax.xlane.f32.xlu1 %v869_v47 }
 0x294   : > { %v693_v54 = vpop.f32.mrf.mxu1 }
 0x295   : > { %v2964_v58 = vmul.f32 0.25, %v693_v54  ;;  %v872_v60 = vmax.f32 %v2958_v46, %v2962_v53 }
 0x296   : > { %v695_v63 = vpop.f32.mrf.mxu1 }
 0x297   : > { %v2968_v1 = vmul.f32 0.25, %v695_v63  ;;  %873 = vmax.xlane.f32.xlu0 %v872_v60 }
 0x298   : > { %v699_v5 = vpop.f32.mrf.mxu1 }
 0x299   : > { %v2970_v6 = vmul.f32 0.25, %v699_v5  ;;  %v875_v10 = vmax.f32 %v2964_v58, %v2968_v1 }
 0x29a   : > { %v701_v14 = vpop.f32.mrf.mxu1 }
 0x29b   : > { %v2974_v15 = vmul.f32 0.25, %v701_v14  ;;  %876 = vmax.xlane.f32.xlu1 %v875_v10 }
 0x29c   : > { %v703_v19 = vpop.f32.mrf.mxu1 }
 0x29d   : > { %v2976_v21 = vmul.f32 0.25, %v703_v19  ;;  %v878_v24 = vmax.f32 %v2970_v6, %v2974_v15 }
 0x29e   : > { %v705_v27 = vpop.f32.mrf.mxu1 }
 0x29f   : > { %v2980_v31 = vmul.f32 0.25, %v705_v27  ;;  %879 = vmax.xlane.f32.xlu0 %v878_v24 }
 0x2a0   : > { %v709_v36 = vpop.f32.mrf.mxu1 }
 0x2a1   : > { %3561 = vst [vmem:[#allocation9_spill] sm:$0xff] %v2980_v31  ;;  %v881_v32 = vmax.f32 %v2976_v21, %v2980_v31 }
 0x2a2   : > { %v711_v39 = vpop.f32.mrf.mxu1 }
 0x2a3   : > { %882 = vmax.xlane.f32.xlu1 %v881_v32 }
 0x2a4   : > { %v713_v41 = vpop.f32.mrf.mxu1 }
 0x2a6   : > { %v715_v44 = vpop.f32.mrf.mxu1 }
 0x2a8   : > { %v2986_v60 = vpop.f32.mrf.mxu1 }
 0x2aa   : > { %v721_v24 = vpop.f32.mrf.mxu1 }
 0x2d0   : > { %v814_v47 = vpop.xlane.xlu1 %813 }
 0x2d1   : > { %v908_v49 = vsub.f32 %v2840_v51, %v814_v47  ;;  %v909_v54 = vsub.f32 %v2842_v52, %v814_v47  ;;  %v2992_v47 = vpop.f32.mrf.mxu1 }
 0x2d3   : > { %v972_v63 = vmul.f32 1.442695, %v908_v49  ;;  %v974_v5 = vmul.f32 1.442695, %v909_v54 }
 0x2d4   : > { %v817_v10 = vpop.xlane.xlu1 %816 }
 0x2d5   : > { %2376 = vpow2.f32 %v972_v63  ;;  %v910_v14 = vsub.f32 %v2846_v56, %v817_v10  ;;  %v911_v19 = vsub.f32 %v2848_v57, %v817_v10 }
 0x2d6   : > { %2378 = vpow2.f32 %v974_v5  ;;  %v725_v5 = vpop.f32.mrf.mxu1 }
 0x2d7   : > { %v976_v27 = vmul.f32 1.442695, %v910_v14  ;;  %v978_v32 = vmul.f32 1.442695, %v911_v19 }
 0x2d8   : > { %v820_v31 = vpop.xlane.xlu1 %819 }
 0x2d9   : > { %2380 = vpow2.f32 %v976_v27  ;;  %v912_v51 = vsub.f32 %v2852_v61, %v820_v31  ;;  %v913_v52 = vsub.f32 %v2854_v62, %v820_v31  ;;  %v2998_v31 = vpop.f32.mrf.mxu1 }
 0x2da   : > { %2382 = vpow2.f32 %v978_v32 }
 0x2db   : > { %v980_v49 = vmul.f32 1.442695, %v912_v51  ;;  %v982_v54 = vmul.f32 1.442695, %v913_v52  ;;  %v3006_v52 = vmul.f32 0.25, %v711_v39  ;;  %v3016_v39 = vmul.f32 0.25, %v713_v41 }
 0x2dc   : > { %v823_v63 = vpop.xlane.xlu1 %822 }
 0x2dd   : > { %2384 = vpow2.f32 %v980_v49  ;;  %v914_v56 = vsub.f32 %v2858_v2, %v823_v63  ;;  %v915_v57 = vsub.f32 %v2860_v3, %v823_v63  ;;  %v3004_v3 = vmul.f32 0.25, %v709_v36  ;;  %v731_v63 = vpop.f32.mrf.mxu1 }
 0x2de   : > { %2386 = vpow2.f32 %v982_v54 }
 0x2df   : > { %v984_v10 = vmul.f32 1.442695, %v914_v56  ;;  %v986_v14 = vmul.f32 1.442695, %v915_v57 }
 0x2e0   : > { %v826_v19 = vpop.xlane.xlu1 %825 }
 0x2e1   : > { %2388 = vpow2.f32 %v984_v10  ;;  %v916_v61 = vsub.f32 %v2864_v7, %v826_v19  ;;  %v917_v62 = vsub.f32 %v2866_v8, %v826_v19 }
 0x2e2   : > { %v3000_v27 = vpop.eup %2376  ;;  %2390 = vpow2.f32 %v986_v14  ;;  %v3018_v14 = vmul.f32 0.25, %v715_v44 }
 0x2e3   : > { %v3002_v32 = vpop.eup %2378  ;;  %v988_v2 = vmul.f32 1.442695, %v916_v61  ;;  %v990_v51 = vmul.f32 1.442695, %v917_v62 }
 0x2e4   : > { %v829_v49 = vpop.xlane.xlu1 %828  ;;  %v1100_v54 = vadd.f32 %v3002_v32, %v3000_v27 }
 0x2e5   : > { %2392 = vpow2.f32 %v988_v2  ;;  %v918_v7 = vsub.f32 %v2870_v12, %v829_v49  ;;  %v919_v8 = vsub.f32 %v2872_v13, %v829_v49  ;;  %v884_v12 = vmax.f32 %v3004_v3, %v3006_v52  ;;  %v733_v2 = vpop.f32.mrf.mxu1 }
 0x2e6   : > { %v3012_v56 = vpop.eup %2380  ;;  %2394 = vpow2.f32 %v990_v51  ;;  %1101 = vadd.xlane.f32.xlu0 %v1100_v54  ;;  %v3031_v54 = vmul.f32 0.25, %v2986_v60 }
 0x2e7   : > { %v3014_v57 = vpop.eup %2382  ;;  %v992_v36 = vmul.f32 1.442695, %v918_v7  ;;  %v994_v10 = vmul.f32 1.442695, %v919_v8  ;;  %v3033_v7 = vmul.f32 0.25, %v721_v24 }
 0x2e8   : > { %v832_v19 = vpop.xlane.xlu1 %831  ;;  %v1103_v61 = vadd.f32 %v3014_v57, %v3012_v56 }
 0x2e9   : > { %2396 = vpow2.f32 %v992_v36  ;;  %v920_v13 = vsub.f32 %v2876_v17, %v832_v19  ;;  %v921_v62 = vsub.f32 %v2878_v18, %v832_v19  ;;  %v887_v18 = vmax.f32 %v3016_v39, %v3018_v14  ;;  %v735_v19 = vpop.f32.mrf.mxu1 }
 0x2ea   : > { %v3026_v51 = vpop.eup %2384  ;;  %2398 = vpow2.f32 %v994_v10  ;;  %1104 = vadd.xlane.f32.xlu1 %v1103_v61  ;;  %885 = vmax.xlane.f32.xlu0 %v884_v12 }
 0x2eb   : > { %3562 = vst [vmem:[#allocation10_spill] sm:$0xff] %v3026_v51  ;;  %v3028_v41 = vpop.eup %2386  ;;  %v996_v44 = vmul.f32 1.442695, %v920_v13  ;;  %v998_v49 = vmul.f32 1.442695, %v921_v62  ;;  %v3046_v13 = vmul.f32 0.25, %v2992_v47 }
 0x2ec   : > { %3563 = vst [vmem:[#allocation11_spill] sm:$0xff] %v3028_v41  ;;  %v835_v8 = vpop.xlane.xlu1 %834  ;;  %v1106_v17 = vadd.f32 %v3028_v41, %v3026_v51  ;;  %v3048_v62 = vmul.f32 0.25, %v725_v5 }
 0x2ed   : > { %2400 = vpow2.f32 %v996_v44  ;;  %v922_v36 = vsub.f32 %v2882_v22, %v835_v8  ;;  %v923_v10 = vsub.f32 %v2884_v23, %v835_v8  ;;  %v890_v23 = vmax.f32 %v3031_v54, %v3033_v7 }
 0x2ee   : > { %v3041_v61 = vpop.eup %2388  ;;  %2402 = vpow2.f32 %v998_v49  ;;  %1107 = vadd.xlane.f32.xlu0 %v1106_v17  ;;  %888 = vmax.xlane.f32.xlu1 %v887_v18  ;;  %v739_v17 = vpop.f32.mrf.mxu1 }
 0x2ef   : > { %3564 = vst [vmem:[#allocation12_spill] sm:$0xff] %v3041_v61  ;;  %v3043_v60 = vpop.eup %2390  ;;  %v1000_v24 = vmul.f32 1.442695, %v922_v36  ;;  %v1002_v12 = vmul.f32 1.442695, %v923_v10  ;;  %v3061_v10 = vmul.f32 0.25, %v2998_v31 }
 0x2f0   : > { %3565 = vst [vmem:[#allocation13_spill] sm:$0xff] %v3043_v60  ;;  %v838_v44 = vpop.xlane.xlu1 %837  ;;  %v1109_v22 = vadd.f32 %v3043_v60, %v3041_v61  ;;  %v3063_v61 = vmul.f32 0.25, %v731_v63 }
 0x2f1   : > { %2404 = vpow2.f32 %v1000_v24  ;;  %v924_v49 = vsub.f32 %v2886_v25, %v838_v44  ;;  %v925_v8 = vsub.f32 %v2890_v28, %v838_v44  ;;  %v893_v28 = vmax.f32 %v3046_v13, %v3048_v62 }
 0x2f2   : > { %v3056_v18 = vpop.eup %2392  ;;  %2406 = vpow2.f32 %v1002_v12  ;;  %1110 = vadd.xlane.f32.xlu1 %v1109_v22  ;;  %891 = vmax.xlane.f32.xlu0 %v890_v23  ;;  %v741_v22 = vpop.f32.mrf.mxu1 }
 0x2f3   : > { %3566 = vst [vmem:[#allocation14_spill] sm:$0xff] %v3056_v18  ;;  %v3058_v47 = vpop.eup %2394  ;;  %v1004_v5 = vmul.f32 1.442695, %v924_v49  ;;  %v1006_v36 = vmul.f32 1.442695, %v925_v8  ;;  %v459_v8 = vpop.f32.mrf.mxu0 }
 0x2f4   : > { %3567 = vst [vmem:[#allocation15_spill] sm:$0xff] %v3058_v47  ;;  %v841_v24 = vpop.xlane.xlu0 %840  ;;  %v1112_v25 = vadd.f32 %v3058_v47, %v3056_v18  ;;  %v3075_v18 = vmul.f32 0.25, %v733_v2  ;;  %v3077_v47 = vmul.f32 0.25, %v735_v19 }
 0x2f5   : > { %2408 = vpow2.f32 %v1004_v5  ;;  %v926_v12 = vsub.f32 %v2892_v30, %v841_v24  ;;  %v927_v44 = vsub.f32 %v2896_v33, %v841_v24  ;;  %v896_v33 = vmax.f32 %v3061_v10, %v3063_v61  ;;  %v461_v2 = vpop.f32.mrf.mxu0 }
 0x2f6   : > { %v3071_v23 = vpop.eup %2396  ;;  %2410 = vpow2.f32 %v1006_v36  ;;  %1113 = vadd.xlane.f32.xlu0 %v1112_v25  ;;  %894 = vmax.xlane.f32.xlu1 %v893_v28  ;;  %v743_v25 = vpop.f32.mrf.mxu1 }
 0x2f7   : > { %3568 = vst [vmem:[#allocation16_spill] sm:$0xff] %v3071_v23  ;;  %v3073_v31 = vpop.eup %2398  ;;  %v1008_v63 = vmul.f32 1.442695, %v926_v12  ;;  %v1010_v49 = vmul.f32 1.442695, %v927_v44  ;;  %v3103_v60 = vmul.f32 0.25, %v743_v25 }
 0x2f8   : > { %3569 = vst [vmem:[#allocation17_spill] sm:$0xff] %v3073_v31  ;;  %v844_v5 = vpop.xlane.xlu1 %843  ;;  %v1115_v30 = vadd.f32 %v3073_v31, %v3071_v23  ;;  %v3089_v23 = vmul.f32 0.25, %v739_v17  ;;  %v3091_v31 = vmul.f32 0.25, %v741_v22 }
 0x2f9   : > { %2412 = vpow2.f32 %v1008_v63  ;;  %v928_v36 = vsub.f32 %v2898_v35, %v844_v5  ;;  %v929_v24 = vsub.f32 %v2902_v38, %v844_v5  ;;  %v899_v38 = vmax.f32 %v3075_v18, %v3077_v47  ;;  %v463_v5 = vpop.f32.mrf.mxu0 }
 0x2fa   : > { %v3085_v28 = vpop.eup %2400  ;;  %2414 = vpow2.f32 %v1010_v49  ;;  %1116 = vadd.xlane.f32.xlu1 %v1115_v30  ;;  %897 = vmax.xlane.f32.xlu0 %v896_v33  ;;  %v745_v49 = vpop.f32.mrf.mxu1 }
 0x2fb   : > { %3570 = vst [vmem:[#allocation18_spill] sm:$0xff] %v3085_v28  ;;  %v3087_v19 = vpop.eup %2402  ;;  %v1012_v12 = vmul.f32 1.442695, %v928_v36  ;;  %v1014_v44 = vmul.f32 1.442695, %v929_v24  ;;  %v465_v17 = vpop.f32.mrf.mxu0 }
 0x2fc   : > { %3571 = vst [vmem:[#allocation19_spill] sm:$0xff] %v3087_v19  ;;  %v847_v63 = vpop.xlane.xlu1 %846  ;;  %v1118_v35 = vadd.f32 %v3087_v19, %v3085_v28  ;;  %v472_v19 = vpack.c.bf16 %v463_v5, %v459_v8  ;;  %v473_v51 = vpack.c.bf16 %v465_v17, %v461_v2 }
 0x2fd   : > { %2416 = vpow2.f32 %v1012_v12  ;;  %v930_v30 = vsub.f32 %v2904_v40, %v847_v63  ;;  %v931_v33 = vsub.f32 %v2908_v43, %v847_v63  ;;  %v3105_v12 = vmul.f32 0.25, %v745_v49 }
 0x2fe   : > { %v3099_v36 = vpop.eup %2404  ;;  %2418 = vpow2.f32 %v1014_v44  ;;  %1119 = vadd.xlane.f32.xlu0 %v1118_v35  ;;  %900 = vmax.xlane.f32.xlu1 %v899_v38  ;;  %v902_v43 = vmax.f32 %v3089_v23, %v3091_v31 }
 0x2ff   : > { %v3101_v22 = vpop.eup %2406  ;;  %v1016_v24 = vmul.f32 1.442695, %v930_v30  ;;  %v1018_v28 = vmul.f32 1.442695, %v931_v33  ;;  %1338 = vmatprep.subr.bf16.mxu0 %v473_v51 }
 0x300   : > { %v850_v41 = vpop.xlane.xlu1 %849  ;;  %v1121_v40 = vadd.f32 %v3101_v22, %v3099_v36  ;;  %1339 = vmatpush1.bf16.xpose.msra.mxu0 %v472_v19 }
 0x301   : > { %2420 = vpow2.f32 %v1016_v24  ;;  %v932_v44 = vsub.f32 %v2910_v45, %v850_v41  ;;  %v933_v63 = vsub.f32 %v2914_v48, %v850_v41  ;;  %v905_v45 = vmax.f32 %v3103_v60, %v3105_v12 }
 0x302   : > { %v3113_v35 = vpop.eup %2408  ;;  %2422 = vpow2.f32 %v1018_v28  ;;  %1122 = vadd.xlane.f32.xlu1 %v1121_v40  ;;  %903 = vmax.xlane.f32.xlu0 %v902_v43 }
 0x303   : > { %v3115_v8 = vpop.eup %2410  ;;  %v1020_v25 = vmul.f32 1.442695, %v932_v44  ;;  %v1022_v2 = vmul.f32 1.442695, %v933_v63 }
 0x304   : > { %v853_v38 = vpop.xlane.xlu1 %852  ;;  %v1124_v5 = vadd.f32 %v3115_v8, %v3113_v35 }
 0x305   : > { %2424 = vpow2.f32 %v1020_v25  ;;  %v934_v48 = vsub.f32 %v2916_v50, %v853_v38  ;;  %v935_v51 = vsub.f32 %v2920_v55, %v853_v38 }
 0x306   : > { %v3123_v41 = vpop.eup %2412  ;;  %2426 = vpow2.f32 %v1022_v2  ;;  %1125 = vadd.xlane.f32.xlu0 %v1124_v5  ;;  %906 = vmax.xlane.f32.xlu1 %v905_v45 }
 0x307   : > { %v3125_v28 = vpop.eup %2414  ;;  %v1024_v19 = vmul.f32 1.442695, %v934_v48  ;;  %v1026_v49 = vmul.f32 1.442695, %v935_v51 }
 0x308   : > { %v856_v30 = vpop.xlane.xlu1 %855  ;;  %v1127_v33 = vadd.f32 %v3125_v28, %v3123_v41 }
 0x309   : > { %2428 = vpow2.f32 %v1024_v19  ;;  %v936_v17 = vsub.f32 %v2922_v59, %v856_v30  ;;  %v937_v50 = vsub.f32 %v2926_v0, %v856_v30 }
 0x30a   : > { %v3131_v24 = vpop.eup %2416  ;;  %2430 = vpow2.f32 %v1026_v49  ;;  %1128 = vadd.xlane.f32.xlu1 %v1127_v33 }
 0x30b   : > { %v3133_v55 = vpop.eup %2418  ;;  %v1028_v40 = vmul.f32 1.442695, %v936_v17  ;;  %v1030_v43 = vmul.f32 1.442695, %v937_v50 }
 0x30c   : > { %v859_v44 = vpop.xlane.xlu1 %858  ;;  %v1130_v63 = vadd.f32 %v3133_v55, %v3131_v24 }
 0x30d   : > { %2432 = vpow2.f32 %v1028_v40  ;;  %v938_v25 = vsub.f32 %v2928_v4, %v859_v44  ;;  %v939_v2 = vsub.f32 %v2932_v9, %v859_v44 }
 0x30e   : > { %v3139_v59 = vpop.eup %2420  ;;  %2434 = vpow2.f32 %v1030_v43  ;;  %1131 = vadd.xlane.f32.xlu0 %v1130_v63 }
 0x30f   : > { %v3141_v0 = vpop.eup %2422  ;;  %v1032_v38 = vmul.f32 1.442695, %v938_v25  ;;  %v1034_v5 = vmul.f32 1.442695, %v939_v2 }
 0x310   : > { %v862_v45 = vpop.xlane.xlu1 %861  ;;  %v1133_v48 = vadd.f32 %v3141_v0, %v3139_v59 }
 0x311   : > { %2436 = vpow2.f32 %v1032_v38  ;;  %v940_v51 = vsub.f32 %v2934_v11, %v862_v45  ;;  %v941_v19 = vsub.f32 %v2938_v16, %v862_v45 }
 0x312   : > { %v3147_v4 = vpop.eup %2424  ;;  %2438 = vpow2.f32 %v1034_v5  ;;  %1134 = vadd.xlane.f32.xlu1 %v1133_v48 }
 0x313   : > { %v3149_v9 = vpop.eup %2426  ;;  %v1036_v49 = vmul.f32 1.442695, %v940_v51  ;;  %v1038_v30 = vmul.f32 1.442695, %v941_v19 }
 0x314   : > { %v865_v33 = vpop.xlane.xlu1 %864  ;;  %v1136_v17 = vadd.f32 %v3149_v9, %v3147_v4 }
 0x315   : > { %2440 = vpow2.f32 %v1036_v49  ;;  %v942_v50 = vsub.f32 %v2940_v20, %v865_v33  ;;  %v943_v40 = vsub.f32 %v2944_v26, %v865_v33 }
 0x316   : > { %v3155_v11 = vpop.eup %2428  ;;  %2442 = vpow2.f32 %v1038_v30  ;;  %1137 = vadd.xlane.f32.xlu0 %v1136_v17 }
 0x317   : > { %v3157_v16 = vpop.eup %2430  ;;  %v1040_v43 = vmul.f32 1.442695, %v942_v50  ;;  %v1042_v44 = vmul.f32 1.442695, %v943_v40 }
 0x318   : > { %v868_v63 = vpop.xlane.xlu1 %867  ;;  %v1139_v25 = vadd.f32 %v3157_v16, %v3155_v11 }
 0x319   : > { %2444 = vpow2.f32 %v1040_v43  ;;  %v944_v2 = vsub.f32 %v2946_v29, %v868_v63  ;;  %v945_v38 = vsub.f32 %v2950_v34, %v868_v63 }
 0x31a   : > { %v3163_v20 = vpop.eup %2432  ;;  %2446 = vpow2.f32 %v1042_v44  ;;  %1140 = vadd.xlane.f32.xlu1 %v1139_v25 }
 0x31b   : > { %v3165_v26 = vpop.eup %2434  ;;  %v1044_v5 = vmul.f32 1.442695, %v944_v2  ;;  %v1046_v45 = vmul.f32 1.442695, %v945_v38 }
 0x31c   : > { %v871_v48 = vpop.xlane.xlu1 %870  ;;  %v1142_v51 = vadd.f32 %v3165_v26, %v3163_v20 }
 0x31d   : > { %2448 = vpow2.f32 %v1044_v5  ;;  %v946_v19 = vsub.f32 %v2952_v37, %v871_v48  ;;  %v947_v49 = vsub.f32 %v2956_v42, %v871_v48 }
 0x31e   : > { %v3171_v29 = vpop.eup %2436  ;;  %2450 = vpow2.f32 %v1046_v45  ;;  %1143 = vadd.xlane.f32.xlu0 %v1142_v51 }
 0x31f   : > { %v3173_v34 = vpop.eup %2438  ;;  %v1048_v30 = vmul.f32 1.442695, %v946_v19  ;;  %v1050_v33 = vmul.f32 1.442695, %v947_v49 }
 0x320   : > { %v874_v17 = vpop.xlane.xlu0 %873  ;;  %v1145_v50 = vadd.f32 %v3173_v34, %v3171_v29 }
 0x321   : > { %2452 = vpow2.f32 %v1048_v30  ;;  %v948_v40 = vsub.f32 %v2958_v46, %v874_v17  ;;  %v949_v43 = vsub.f32 %v2962_v53, %v874_v17 }
 0x322   : > { %v3179_v37 = vpop.eup %2440  ;;  %2454 = vpow2.f32 %v1050_v33  ;;  %1146 = vadd.xlane.f32.xlu1 %v1145_v50 }
 0x323   : > { %v3181_v42 = vpop.eup %2442  ;;  %v1052_v44 = vmul.f32 1.442695, %v948_v40  ;;  %v1054_v63 = vmul.f32 1.442695, %v949_v43 }
 0x324   : > { %v877_v25 = vpop.xlane.xlu1 %876  ;;  %v1148_v2 = vadd.f32 %v3181_v42, %v3179_v37 }
 0x325   : > { %2456 = vpow2.f32 %v1052_v44  ;;  %v950_v38 = vsub.f32 %v2964_v58, %v877_v25  ;;  %v951_v5 = vsub.f32 %v2968_v1, %v877_v25  ;;  %v3572_v44 = vld [vmem:[#allocation9_spill] sm:$0xff] }
 0x326   : > { %v3187_v46 = vpop.eup %2444  ;;  %2458 = vpow2.f32 %v1054_v63  ;;  %1149 = vadd.xlane.f32.xlu0 %v1148_v2 }
 0x327   : > { %v3189_v53 = vpop.eup %2446  ;;  %v1056_v45 = vmul.f32 1.442695, %v950_v38  ;;  %v1058_v48 = vmul.f32 1.442695, %v951_v5 }
 0x328   : > { %v880_v51 = vpop.xlane.xlu0 %879  ;;  %v1151_v19 = vadd.f32 %v3189_v53, %v3187_v46 }
 0x329   : > { %2460 = vpow2.f32 %v1056_v45  ;;  %v952_v49 = vsub.f32 %v2970_v6, %v880_v51  ;;  %v953_v30 = vsub.f32 %v2974_v15, %v880_v51 }
 0x32a   : > { %v3195_v58 = vpop.eup %2448  ;;  %2462 = vpow2.f32 %v1058_v48  ;;  %1152 = vadd.xlane.f32.xlu1 %v1151_v19 }
 0x32b   : > { %v3197_v1 = vpop.eup %2450  ;;  %v1060_v33 = vmul.f32 1.442695, %v952_v49  ;;  %v1062_v17 = vmul.f32 1.442695, %v953_v30 }
 0x32c   : > { %v883_v50 = vpop.xlane.xlu1 %882  ;;  %v1154_v40 = vadd.f32 %v3197_v1, %v3195_v58 }
 0x32d   : > { %2464 = vpow2.f32 %v1060_v33  ;;  %v954_v43 = vsub.f32 %v2976_v21, %v883_v50  ;;  %v955_v63 = vsub.f32 %v3572_v44, %v883_v50 }
 0x32e   : > { %v3203_v6 = vpop.eup %2452  ;;  %2466 = vpow2.f32 %v1062_v17  ;;  %1155 = vadd.xlane.f32.xlu0 %v1154_v40 }
 0x32f   : > { %v3205_v15 = vpop.eup %2454  ;;  %v1064_v25 = vmul.f32 1.442695, %v954_v43  ;;  %v1066_v2 = vmul.f32 1.442695, %v955_v63 }
 0x330   : > { %v1157_v38 = vadd.f32 %v3205_v15, %v3203_v6 }
 0x331   : > { %2468 = vpow2.f32 %v1064_v25 }
 0x332   : > { %v3209_v5 = vpop.eup %2456  ;;  %2470 = vpow2.f32 %v1066_v2  ;;  %1158 = vadd.xlane.f32.xlu1 %v1157_v38 }
 0x333   : > { %v3211_v45 = vpop.eup %2458 }
 0x334   : > { %v1160_v21 = vadd.f32 %v3211_v45, %v3209_v5 }
 0x336   : > { %v3215_v48 = vpop.eup %2460  ;;  %1161 = vadd.xlane.f32.xlu0 %v1160_v21 }
 0x337   : > { %v3217_v51 = vpop.eup %2462 }
 0x338   : > { %v1163_v19 = vadd.f32 %v3217_v51, %v3215_v48 }
 0x33a   : > { %v3221_v49 = vpop.eup %2464  ;;  %1164 = vadd.xlane.f32.xlu1 %v1163_v19 }
 0x33b   : > { %3573 = vst [vmem:[#allocation9_spill] sm:$0xff] %v3221_v49  ;;  %v3223_v30 = vpop.eup %2466 }
 0x33c   : > { %3574 = vst [vmem:[#allocation20_spill] sm:$0xff] %v3223_v30  ;;  %v1166_v33 = vadd.f32 %v3223_v30, %v3221_v49 }
 0x33e   : > { %v3227_v17 = vpop.eup %2468  ;;  %1167 = vadd.xlane.f32.xlu0 %v1166_v33 }
 0x33f   : > { %3575 = vst [vmem:[#allocation21_spill] sm:$0xff] %v3227_v17  ;;  %v3229_v50 = vpop.eup %2470 }
 0x340   : > { %3576 = vst [vmem:[#allocation22_spill] sm:$0xff] %v3229_v50  ;;  %v1169_v40 = vadd.f32 %v3229_v50, %v3227_v17 }
 0x342   : > { %1170 = vadd.xlane.f32.xlu1 %v1169_v40 }
 0x36f   : > { %v1102_v43 = vpop.xlane.xlu0 %1101 }
 0x370   : > { %2472 = vrcp.f32 %v1102_v43 }
 0x373   : > { %v1105_v44 = vpop.xlane.xlu1 %1104  ;;  %v886_v63 = vpop.xlane.xlu0 %885 }
 0x374   : > { %2474 = vrcp.f32 %v1105_v44  ;;  %v956_v25 = vsub.f32 %v3004_v3, %v886_v63  ;;  %v957_v2 = vsub.f32 %v3006_v52, %v886_v63 }
 0x376   : > { %v1068_v38 = vmul.f32 1.442695, %v956_v25  ;;  %v1070_v21 = vmul.f32 1.442695, %v957_v2 }
 0x377   : > { %v1108_v19 = vpop.xlane.xlu0 %1107  ;;  %v889_v49 = vpop.xlane.xlu1 %888 }
 0x378   : > { %2476 = vpow2.f32 %v1068_v38  ;;  %v958_v33 = vsub.f32 %v3016_v39, %v889_v49  ;;  %v959_v30 = vsub.f32 %v3018_v14, %v889_v49 }
 0x379   : > { %2478 = vpow2.f32 %v1070_v21 }
 0x37a   : > { %v1072_v40 = vmul.f32 1.442695, %v958_v33  ;;  %v1074_v17 = vmul.f32 1.442695, %v959_v30  ;;  %2480 = vrcp.f32 %v1108_v19 }
 0x37b   : > { %v1111_v43 = vpop.xlane.xlu1 %1110  ;;  %v892_v50 = vpop.xlane.xlu0 %891 }
 0x37c   : > { %2482 = vpow2.f32 %v1072_v40  ;;  %v960_v3 = vsub.f32 %v3031_v54, %v892_v50  ;;  %v961_v52 = vsub.f32 %v3033_v7, %v892_v50 }
 0x37d   : > { %2484 = vpow2.f32 %v1074_v17  ;;  %v2473_v25 = vpop.eup %2472 }
 0x37e   : > { %2486 = vrcp.f32 %v1111_v43  ;;  %v1076_v44 = vmul.f32 1.442695, %v960_v3  ;;  %v1078_v63 = vmul.f32 1.442695, %v961_v52  ;;  %v1198_v54 = vmul.f32 %v2473_v25, %v3002_v32 }
 0x37f   : > { %v1114_v2 = vpop.xlane.xlu0 %1113  ;;  %v895_v39 = vpop.xlane.xlu1 %894  ;;  %v1197_v19 = vmul.f32 %v2473_v25, %v3000_v27 }
 0x380   : > { %2488 = vpow2.f32 %v1076_v44  ;;  %v962_v14 = vsub.f32 %v3046_v13, %v895_v39  ;;  %v963_v49 = vsub.f32 %v3048_v62, %v895_v39 }
 0x381   : > { %v2475_v30 = vpop.eup %2474  ;;  %2490 = vpow2.f32 %v1078_v63 }
 0x382   : > { %v1080_v38 = vmul.f32 1.442695, %v962_v14  ;;  %v1082_v21 = vmul.f32 1.442695, %v963_v49  ;;  %v1201_v7 = vmul.f32 %v2475_v30, %v3014_v57  ;;  %2492 = vrcp.f32 %v1114_v2 }
 0x383   : > { %v1117_v17 = vpop.xlane.xlu1 %1116  ;;  %v898_v50 = vpop.xlane.xlu0 %897  ;;  %v1200_v33 = vmul.f32 %v2475_v30, %v3012_v56 }
 0x384   : > { %2494 = vpow2.f32 %v1080_v38  ;;  %v964_v13 = vsub.f32 %v3061_v10, %v898_v50  ;;  %v965_v62 = vsub.f32 %v3063_v61, %v898_v50  ;;  %v1293_v40 = vpack.c.bf16 %v1201_v7, %v1198_v54  ;;  %v3577_v54 = vld [vmem:[#allocation11_spill] sm:$0xff] }
 0x385   : > { %v3247_v43 = vpop.eup %2476  ;;  %2496 = vpow2.f32 %v1082_v21  ;;  %v1292_v3 = vpack.c.bf16 %v1200_v33, %v1197_v19  ;;  %v3579_v33 = vld [vmem:[#allocation10_spill] sm:$0xff] }
 0x386   : > { %v3249_v32 = vpop.eup %2478  ;;  %2498 = vrcp.f32 %v1117_v17  ;;  %v1084_v57 = vmul.f32 1.442695, %v964_v13  ;;  %v1086_v52 = vmul.f32 1.442695, %v965_v62  ;;  %1356 = vmatprep.mubr.bf16.mxu0 %v1293_v40  ;;  %v3578_v17 = vld [vmem:[#allocation13_spill] sm:$0xff]  ;;  %v3580_v62 = vld [vmem:[#allocation12_spill] sm:$0xff] }
 0x387   : > { %v1120_v44 = vpop.xlane.xlu0 %1119  ;;  %v901_v27 = vpop.xlane.xlu1 %900  ;;  %1357 = vmatmul.mubr.bf16.vlgmr.msra.gmra.mxu0 %v1292_v3  ;;  %v1172_v56 = vadd.f32 %v3249_v32, %v3247_v43 }
 0x388   : > { %v2481_v10 = vpop.eup %2480  ;;  %2500 = vpow2.f32 %v1084_v57  ;;  %v966_v61 = vsub.f32 %v3075_v18, %v901_v27  ;;  %v967_v63 = vsub.f32 %v3077_v47, %v901_v27 }
 0x389   : > { %v3255_v25 = vpop.eup %2482  ;;  %2502 = vpow2.f32 %v1086_v52  ;;  %1173 = vadd.xlane.f32.xlu0 %v1172_v56  ;;  %v1204_v7 = vmul.f32 %v2481_v10, %v3577_v54  ;;  %v1203_v13 = vmul.f32 %v2481_v10, %v3579_v33 }
 0x38a   : > { %v3257_v2 = vpop.eup %2484  ;;  %v1088_v39 = vmul.f32 1.442695, %v966_v61  ;;  %v1090_v14 = vmul.f32 1.442695, %v967_v63  ;;  %2504 = vrcp.f32 %v1120_v44 }
 0x38b   : > { %v2487_v49 = vpop.eup %2486  ;;  %v1123_v30 = vpop.xlane.xlu1 %1122  ;;  %v1175_v21 = vadd.f32 %v3257_v2, %v3255_v25 }
 0x38c   : > { %v904_v38 = vpop.xlane.xlu0 %903  ;;  %2506 = vpow2.f32 %v1088_v39  ;;  %v1207_v50 = vmul.f32 %v2487_v49, %v3578_v17  ;;  %v1206_v40 = vmul.f32 %v2487_v49, %v3580_v62 }
 0x38d   : > { %v968_v18 = vsub.f32 %v3089_v23, %v904_v38  ;;  %v969_v47 = vsub.f32 %v3091_v31, %v904_v38  ;;  %v3265_v19 = vpop.eup %2488  ;;  %2508 = vpow2.f32 %v1090_v14  ;;  %1176 = vadd.xlane.f32.xlu1 %v1175_v21 }
 0x38e   : > { %v3269_v3 = vpop.eup %2490  ;;  %2510 = vrcp.f32 %v1123_v30  ;;  %v1295_v44 = vpack.c.bf16 %v1207_v50, %v1204_v7  ;;  %v1294_v23 = vpack.c.bf16 %v1206_v40, %v1203_v13  ;;  %v3581_v7 = vld [vmem:[#allocation15_spill] sm:$0xff]  ;;  %v3584_v50 = vld [vmem:[#allocation16_spill] sm:$0xff] }
 0x38f   : > { %v1092_v57 = vmul.f32 1.442695, %v968_v18  ;;  %v1094_v52 = vmul.f32 1.442695, %v969_v47  ;;  %v907_v27 = vpop.xlane.xlu1 %906  ;;  %v1178_v31 = vadd.f32 %v3269_v3, %v3265_v19  ;;  %v2493_v56 = vpop.eup %2492  ;;  %v3583_v47 = vld [vmem:[#allocation14_spill] sm:$0xff] }
 0x390   : > { %1364 = vmatprep.mubr.bf16.mxu0 %v1295_v44  ;;  %v1126_v61 = vpop.xlane.xlu0 %1125  ;;  %v970_v63 = vsub.f32 %v3103_v60, %v907_v27  ;;  %v971_v10 = vsub.f32 %v3105_v12, %v907_v27  ;;  %v1210_v60 = vmul.f32 %v2493_v56, %v3581_v7  ;;  %v3582_v12 = vld [vmem:[#allocation17_spill] sm:$0xff]  ;;  %v1209_v17 = vmul.f32 %v2493_v56, %v3583_v47  ;;  %v2368_v27 = vld [vmem:[%s2781_s6 + $0x38] sm:$0xff]  }
 0x391   : > { %2512 = vpow2.f32 %v1092_v57  ;;  %v3275_v39 = vpop.eup %2494  ;;  %1365 = vmatmul.mubr.bf16.gmra.mxu0 %v1294_v23  ;;  %1179 = vadd.xlane.f32.xlu0 %v1178_v31  ;;  %v1627_v56 = vsel %vm506_vm0, %v2368_v27, 0 }
 0x392   : > { %2514 = vpow2.f32 %v1094_v52  ;;  %v3277_v14 = vpop.eup %2496  ;;  %v1096_v49 = vmul.f32 1.442695, %v970_v63  ;;  %v1098_v30 = vmul.f32 1.442695, %v971_v10  ;;  %2257 = vmatprep.subr.msk.bf16.mxu1 %vm506_vm0, %v2368_v27 }
 0x393   : > { %v2499_v38 = vpop.eup %2498  ;;  %2516 = vrcp.f32 %v1126_v61  ;;  %v1129_v21 = vpop.xlane.xlu1 %1128  ;;  %v1181_v54 = vadd.f32 %v3277_v14, %v3275_v39  ;;  %2210 = vmatpush3.bf16.xpose.msra.mxu1 %v1627_v56 }
 0x394   : > { %2518 = vpow2.f32 %v1096_v49  ;;  %v1213_v18 = vmul.f32 %v2499_v38, %v3582_v12  ;;  %v1212_v33 = vmul.f32 %v2499_v38, %v3584_v50 }
 0x395   : > { %v3285_v13 = vpop.eup %2500  ;;  %2520 = vpow2.f32 %v1098_v30  ;;  %1182 = vadd.xlane.f32.xlu1 %v1181_v54  ;;  %v3585_v30 = vld [vmem:[#allocation19_spill] sm:$0xff]  ;;  %v3586_v54 = vld [vmem:[#allocation18_spill] sm:$0xff] }
 0x396   : > { %v3287_v62 = vpop.eup %2502  ;;  %2522 = vrcp.f32 %v1129_v21  ;;  %v1297_v40 = vpack.c.bf16 %v1213_v18, %v1210_v60  ;;  %v1296_v57 = vpack.c.bf16 %v1212_v33, %v1209_v17 }
 0x397   : > { %v1132_v52 = vpop.xlane.xlu0 %1131  ;;  %v1184_v44 = vadd.f32 %v3287_v62, %v3285_v13  ;;  %v2505_v23 = vpop.eup %2504 }
 0x398   : > { %1372 = vmatprep.mubr.bf16.mxu0 %v1297_v40  ;;  %2524 = vrcp.f32 %v1132_v52  ;;  %v1216_v38 = vmul.f32 %v2505_v23, %v3585_v30  ;;  %v1215_v7 = vmul.f32 %v2505_v23, %v3586_v54  ;;  %v2369_v40 = vld [vmem:[%s2781_s6 + $0x30] sm:$0xff]  }
 0x399   : > { %v3292_v31 = vpop.eup %2506  ;;  %1373 = vmatmul.mubr.bf16.gmra.mxu0 %v1296_v57  ;;  %1185 = vadd.xlane.f32.xlu0 %v1184_v44 }
 0x39a   : > { %v3295_v61 = vpop.eup %2508  ;;  %2258 = vmatprep.subr.msk.bf16.mxu1 %vm506_vm0, %v2369_v40 }
 0x39b   : > { %v2511_v63 = vpop.eup %2510  ;;  %v1135_v10 = vpop.xlane.xlu1 %1134  ;;  %v1187_v49 = vadd.f32 %v3295_v61, %v3292_v31 }
 0x39c   : > { %2526 = vrcp.f32 %v1135_v10  ;;  %v1219_v21 = vmul.f32 %v2511_v63, %v3101_v22  ;;  %v1218_v60 = vmul.f32 %v2511_v63, %v3099_v36  ;;  %v1624_v36 = vsel %vm506_vm0, %v2369_v40, 0 }
 0x39d   : > { %1188 = vadd.xlane.f32.xlu1 %v1187_v49  ;;  %2212 = vmatpush3.bf16.xpose.msra.mxu1 %v1624_v36  ;;  %v2371_v36 = vld [vmem:[%s2781_s6 + $0x20] sm:$0xff]  }
 0x39e   : > { %v3304_v12 = vpop.eup %2512  ;;  %v1299_v47 = vpack.c.bf16 %v1219_v21, %v1216_v38  ;;  %v1298_v17 = vpack.c.bf16 %v1218_v60, %v1215_v7  ;;  %v2370_v7 = vld [vmem:[%s2781_s6 + $0x28] sm:$0xff]  }
 0x39f   : > { %v3306_v18 = vpop.eup %2514  ;;  %v1138_v50 = vpop.xlane.xlu0 %1137  ;;  %2259 = vmatprep.subr.msk.bf16.mxu1 %vm506_vm0, %v2370_v7 }
 0x3a0   : > { %v1190_v33 = vadd.f32 %v3306_v18, %v3304_v12  ;;  %v2517_v57 = vpop.eup %2516  ;;  %1380 = vmatprep.mubr.bf16.mxu0 %v1299_v47  ;;  %2528 = vrcp.f32 %v1138_v50 }
 0x3a1   : > { %v3311_v52 = vpop.eup %2518  ;;  %1381 = vmatmul.mubr.bf16.gmra.mxu0 %v1298_v17  ;;  %v1222_v56 = vmul.f32 %v2517_v57, %v3115_v8  ;;  %v1221_v10 = vmul.f32 %v2517_v57, %v3113_v35  ;;  %v1621_v8 = vsel %vm506_vm0, %v2370_v7, 0 }
 0x3a2   : > { %1191 = vadd.xlane.f32.xlu0 %v1190_v33  ;;  %v3314_v22 = vpop.eup %2520 }
 0x3a3   : > { %v2523_v44 = vpop.eup %2522  ;;  %v1141_v27 = vpop.xlane.xlu1 %1140  ;;  %v1193_v23 = vadd.f32 %v3314_v22, %v3311_v52 }
 0x3a4   : > { %2530 = vrcp.f32 %v1141_v27  ;;  %v1225_v63 = vmul.f32 %v2523_v44, %v3125_v28  ;;  %v1224_v49 = vmul.f32 %v2523_v44, %v3123_v41  ;;  %v2372_v27 = vld [vmem:[%s2781_s6 + $0x18] sm:$0xff]  }
 0x3a5   : > { %1194 = vadd.xlane.f32.xlu1 %v1193_v23  ;;  %v2525_v21 = vpop.eup %2524  ;;  %2214 = vmatpush3.bf16.xpose.msra.mxu1 %v1621_v8 }
 0x3a6   : > { %v1301_v30 = vpack.c.bf16 %v1225_v63, %v1222_v56  ;;  %v1300_v38 = vpack.c.bf16 %v1224_v49, %v1221_v10  ;;  %v1228_v28 = vmul.f32 %v2525_v21, %v3133_v55  ;;  %v1227_v17 = vmul.f32 %v2525_v21, %v3131_v24  ;;  %2260 = vmatprep.subr.msk.bf16.mxu1 %vm506_vm0, %v2371_v36  ;;  %v2373_v21 = vld [vmem:[%s2781_s6 + $0x10] sm:$0xff]  }
 0x3a7   : > { %v1144_v54 = vpop.xlane.xlu0 %1143  ;;  %v1618_v55 = vsel %vm506_vm0, %v2371_v36, 0 }
 0x3a8   : > { %1388 = vmatprep.mubr.bf16.mxu0 %v1301_v30  ;;  %2532 = vrcp.f32 %v1144_v54 }
 0x3a9   : > { %v2527_v60 = vpop.eup %2526  ;;  %1389 = vmatmul.mubr.bf16.gmra.mxu0 %v1300_v38 }
 0x3aa   : > { %v1231_v35 = vmul.f32 %v2527_v60, %v3141_v0  ;;  %v1230_v41 = vmul.f32 %v2527_v60, %v3139_v59 }
 0x3ab   : > { %v1147_v47 = vpop.xlane.xlu1 %1146 }
 0x3ac   : > { %2534 = vrcp.f32 %v1147_v47  ;;  %v1303_v50 = vpack.c.bf16 %v1231_v35, %v1228_v28  ;;  %v1302_v33 = vpack.c.bf16 %v1230_v41, %v1227_v17  ;;  %v2374_v47 = vld [vmem:[%s2781_s6 + $0x8] sm:$0xff]  }
 0x3ad   : > { %v2529_v40 = vpop.eup %2528  ;;  %2216 = vmatpush3.bf16.xpose.msra.mxu1 %v1618_v55 }
 0x3ae   : > { %1396 = vmatprep.mubr.bf16.mxu0 %v1303_v50  ;;  %v1234_v59 = vmul.f32 %v2529_v40, %v3149_v9  ;;  %v1233_v56 = vmul.f32 %v2529_v40, %v3147_v4  ;;  %2261 = vmatprep.subr.msk.bf16.mxu1 %vm506_vm0, %v2372_v27  ;;  %v1615_v9 = vsel %vm506_vm0, %v2372_v27, 0  ;;  %v2375_v27 = vld [vmem:[%s2781_s6] sm:$0xff]  }
 0x3af   : > { %v1150_v57 = vpop.xlane.xlu0 %1149 }
 0x3b0   : > { %2536 = vrcp.f32 %v1150_v57 }
 0x3b1   : > { %v2531_v44 = vpop.eup %2530  ;;  %1397 = vmatmul.mubr.bf16.gmra.mxu0 %v1302_v33 }
 0x3b2   : > { %v1237_v24 = vmul.f32 %v2531_v44, %v3157_v16  ;;  %v1236_v0 = vmul.f32 %v2531_v44, %v3155_v11 }
 0x3b3   : > { %v1153_v23 = vpop.xlane.xlu1 %1152 }
 0x3b4   : > { %2538 = vrcp.f32 %v1153_v23  ;;  %v1305_v63 = vpack.c.bf16 %v1237_v24, %v1234_v59  ;;  %v1304_v10 = vpack.c.bf16 %v1236_v0, %v1233_v56 }
 0x3b5   : > { %v2533_v49 = vpop.eup %2532  ;;  %2218 = vmatpush3.bf16.xpose.msra.mxu1 %v1615_v9 }
 0x3b6   : > { %1404 = vmatprep.mubr.bf16.mxu0 %v1305_v63  ;;  %v1240_v11 = vmul.f32 %v2533_v49, %v3165_v26  ;;  %v1239_v7 = vmul.f32 %v2533_v49, %v3163_v20  ;;  %2262 = vmatprep.subr.msk.bf16.mxu1 %vm506_vm0, %v2373_v21  ;;  %v1612_v26 = vsel %vm506_vm0, %v2373_v21, 0  ;;  %v3589_v21 = vld [vmem:[#allocation21_spill] sm:$0xff] }
 0x3b7   : > { %v1156_v30 = vpop.xlane.xlu0 %1155 }
 0x3b8   : > { %2540 = vrcp.f32 %v1156_v30 }
 0x3b9   : > { %v2535_v38 = vpop.eup %2534  ;;  %1405 = vmatmul.mubr.bf16.gmra.mxu0 %v1304_v10 }
 0x3ba   : > { %v1243_v16 = vmul.f32 %v2535_v38, %v3173_v34  ;;  %v1242_v4 = vmul.f32 %v2535_v38, %v3171_v29  ;;  %v3587_v38 = vld [vmem:[#allocation20_spill] sm:$0xff] }
 0x3bb   : > { %v1159_v54 = vpop.xlane.xlu1 %1158 }
 0x3bc   : > { %2542 = vrcp.f32 %v1159_v54  ;;  %v1307_v60 = vpack.c.bf16 %v1243_v16, %v1240_v11  ;;  %v1306_v8 = vpack.c.bf16 %v1242_v4, %v1239_v7  ;;  %v3588_v16 = vld [vmem:[#allocation22_spill] sm:$0xff] }
 0x3bd   : > { %v2537_v28 = vpop.eup %2536  ;;  %2220 = vmatpush3.bf16.xpose.msra.mxu1 %v1612_v26 }
 0x3be   : > { %1412 = vmatprep.mubr.bf16.mxu0 %v1307_v60  ;;  %v1246_v29 = vmul.f32 %v2537_v28, %v3181_v42  ;;  %v1245_v50 = vmul.f32 %v2537_v28, %v3179_v37  ;;  %2263 = vmatprep.subr.msk.bf16.mxu1 %vm506_vm0, %v2374_v47  ;;  %v1609_v42 = vsel %vm506_vm0, %v2374_v47, 0 }
 0x3bf   : > { %v1162_v35 = vpop.xlane.xlu0 %1161 }
 0x3c0   : > { %2544 = vrcp.f32 %v1162_v35 }
 0x3c1   : > { %v2539_v41 = vpop.eup %2538  ;;  %1413 = vmatmul.mubr.bf16.gmra.mxu0 %v1306_v8 }
 0x3c2   : > { %v1249_v34 = vmul.f32 %v2539_v41, %v3189_v53  ;;  %v1248_v20 = vmul.f32 %v2539_v41, %v3187_v46 }
 0x3c3   : > { %v1165_v17 = vpop.xlane.xlu1 %1164 }
 0x3c4   : > { %2546 = vrcp.f32 %v1165_v17  ;;  %v1309_v33 = vpack.c.bf16 %v1249_v34, %v1246_v29  ;;  %v1308_v40 = vpack.c.bf16 %v1248_v20, %v1245_v50 }
 0x3c5   : > { %v2541_v57 = vpop.eup %2540  ;;  %2222 = vmatpush3.bf16.xpose.msra.mxu1 %v1609_v42 }
 0x3c6   : > { %1420 = vmatprep.mubr.bf16.mxu0 %v1309_v33  ;;  %v1252_v46 = vmul.f32 %v2541_v57, %v3197_v1  ;;  %v1251_v59 = vmul.f32 %v2541_v57, %v3195_v58  ;;  %2264 = vmatprep.subr.msk.bf16.mxu1 %vm506_vm0, %v2375_v27  ;;  %v1606_v1 = vsel %vm506_vm0, %v2375_v27, 0 }
 0x3c7   : > { %v1168_v36 = vpop.xlane.xlu0 %1167 }
 0x3c8   : > { %2548 = vrcp.f32 %v1168_v36 }
 0x3c9   : > { %v2543_v44 = vpop.eup %2542  ;;  %1421 = vmatmul.mubr.bf16.gmra.mxu0 %v1308_v40 }
 0x3ca   : > { %v1255_v53 = vmul.f32 %v2543_v44, %v3205_v15  ;;  %v1254_v37 = vmul.f32 %v2543_v44, %v3203_v6 }
 0x3cb   : > { %v1171_v55 = vpop.xlane.xlu1 %1170 }
 0x3cc   : > { %2550 = vrcp.f32 %v1171_v55  ;;  %v1311_v24 = vpack.c.bf16 %v1255_v53, %v1252_v46  ;;  %v1310_v0 = vpack.c.bf16 %v1254_v37, %v1251_v59 }
 0x3cd   : > { %v2545_v23 = vpop.eup %2544  ;;  %2224 = vmatpush3.bf16.xpose.msra.mxu1 %v1606_v1 }
 0x3ce   : > { %1428 = vmatprep.mubr.bf16.mxu0 %v1311_v24  ;;  %v1258_v15 = vmul.f32 %v2545_v23, %v3211_v45  ;;  %v1257_v58 = vmul.f32 %v2545_v23, %v3209_v5  ;;  %v3590_v45 = vld [vmem:[#allocation9_spill] sm:$0xff] }
 0x3d1   : > { %v2547_v56 = vpop.eup %2546  ;;  %1429 = vmatmul.mubr.bf16.gmra.mxu0 %v1310_v0 }
 0x3d2   : > { %v1261_v6 = vmul.f32 %v2547_v56, %v3217_v51  ;;  %v1260_v63 = vmul.f32 %v2547_v56, %v3215_v48 }
 0x3d4   : > { %v1313_v10 = vpack.c.bf16 %v1261_v6, %v1258_v15  ;;  %v1312_v49 = vpack.c.bf16 %v1260_v63, %v1257_v58 }
 0x3d5   : > { %v2549_v30 = vpop.eup %2548 }
 0x3d6   : > { %1436 = vmatprep.mubr.bf16.mxu0 %v1313_v10  ;;  %v1264_v11 = vmul.f32 %v2549_v30, %v3587_v38  ;;  %v1263_v7 = vmul.f32 %v2549_v30, %v3590_v45 }
 0x3d9   : > { %v2551_v9 = vpop.eup %2550  ;;  %1437 = vmatmul.mubr.bf16.gmra.mxu0 %v1312_v49 }
 0x3da   : > { %v1267_v4 = vmul.f32 %v2551_v9, %v3588_v16  ;;  %v1266_v54 = vmul.f32 %v2551_v9, %v3589_v21 }
 0x3dc   : > { %v1315_v51 = vpack.c.bf16 %v1267_v4, %v1264_v11  ;;  %v1314_v60 = vpack.c.bf16 %v1266_v54, %v1263_v7 }
 0x3de   : > { %1444 = vmatprep.mubr.bf16.mxu0 %v1315_v51 }
 0x3e1   : > { %1445 = vmatmul.mubr.bf16.gmra.mxu0 %v1314_v60 }
 0x412   : > { %v1174_v5 = vpop.xlane.xlu0 %1173 }
 0x413   : > { %2552 = vrcp.f32 %v1174_v5 }
 0x416   : > { %v1177_v48 = vpop.xlane.xlu1 %1176 }
 0x417   : > { %2554 = vrcp.f32 %v1177_v48 }
 0x41a   : > { %v1180_v8 = vpop.xlane.xlu0 %1179 }
 0x41b   : > { %2556 = vrcp.f32 %v1180_v8 }
 0x41e   : > { %v1183_v28 = vpop.xlane.xlu1 %1182 }
 0x41f   : > { %2558 = vrcp.f32 %v1183_v28 }
 0x420   : > { %v2553_v35 = vpop.eup %2552 }
 0x421   : > { %v1270_v29 = vmul.f32 %v2553_v35, %v3249_v32  ;;  %v1269_v20 = vmul.f32 %v2553_v35, %v3247_v43 }
 0x422   : > { %v1186_v26 = vpop.xlane.xlu0 %1185 }
 0x423   : > { %2560 = vrcp.f32 %v1186_v26 }
 0x424   : > { %v2555_v41 = vpop.eup %2554 }
 0x425   : > { %v1273_v34 = vmul.f32 %v2555_v41, %v3257_v2  ;;  %v1272_v47 = vmul.f32 %v2555_v41, %v3255_v25 }
 0x426   : > { %v1189_v17 = vpop.xlane.xlu1 %1188 }
 0x427   : > { %2562 = vrcp.f32 %v1189_v17  ;;  %v1317_v50 = vpack.c.bf16 %v1273_v34, %v1270_v29  ;;  %v1316_v33 = vpack.c.bf16 %v1272_v47, %v1269_v20 }
 0x428   : > { %v2557_v40 = vpop.eup %2556 }
 0x429   : > { %1452 = vmatprep.mubr.bf16.mxu0 %v1317_v50  ;;  %v1276_v42 = vmul.f32 %v2557_v40, %v3269_v3  ;;  %v1275_v2 = vmul.f32 %v2557_v40, %v3265_v19 }
 0x42a   : > { %1453 = vmatmul.mubr.bf16.gmra.mxu0 %v1316_v33 }
 0x42b   : > { %v1192_v57 = vpop.xlane.xlu0 %1191 }
 0x42c   : > { %v2559_v36 = vpop.eup %2558  ;;  %2564 = vrcp.f32 %v1192_v57 }
 0x42d   : > { %v1279_v32 = vmul.f32 %v2559_v36, %v3277_v14  ;;  %v1278_v43 = vmul.f32 %v2559_v36, %v3275_v39 }
 0x42e   : > { %v1195_v44 = vpop.xlane.xlu1 %1194 }
 0x42f   : > { %2566 = vrcp.f32 %v1195_v44  ;;  %v1319_v25 = vpack.c.bf16 %v1279_v32, %v1276_v42  ;;  %v1318_v46 = vpack.c.bf16 %v1278_v43, %v1275_v2 }
 0x430   : > { %v2561_v53 = vpop.eup %2560 }
 0x431   : > { %1460 = vmatprep.mubr.bf16.mxu0 %v1319_v25  ;;  %v1282_v55 = vmul.f32 %v2561_v53, %v3287_v62  ;;  %v1281_v3 = vmul.f32 %v2561_v53, %v3285_v13 }
 0x432   : > { %1461 = vmatmul.mubr.bf16.gmra.mxu0 %v1318_v46 }
 0x434   : > { %v2563_v37 = vpop.eup %2562 }
 0x435   : > { %v1285_v59 = vmul.f32 %v2563_v37, %v3295_v61  ;;  %v1284_v14 = vmul.f32 %v2563_v37, %v3292_v31 }
 0x437   : > { %v1321_v24 = vpack.c.bf16 %v1285_v59, %v1282_v55  ;;  %v1320_v19 = vpack.c.bf16 %v1284_v14, %v1281_v3 }
 0x439   : > { %1468 = vmatprep.mubr.bf16.mxu0 %v1321_v24  ;;  %v2565_v39 = vpop.eup %2564 }
 0x43a   : > { %1469 = vmatmul.mubr.bf16.gmra.mxu0 %v1320_v19  ;;  %v1288_v27 = vmul.f32 %v2565_v39, %v3306_v18  ;;  %v1287_v56 = vmul.f32 %v2565_v39, %v3304_v12 }
 0x43c   : > { %v2567_v0 = vpop.eup %2566 }
 0x43d   : > { %v1291_v23 = vmul.f32 %v2567_v0, %v3314_v22  ;;  %v1290_v62 = vmul.f32 %v2567_v0, %v3311_v52 }
 0x43f   : > { %v1323_v1 = vpack.c.bf16 %v1291_v23, %v1288_v27  ;;  %v1322_v61 = vpack.c.bf16 %v1290_v62, %v1287_v56 }
 0x441   : > { %1476 = vmatprep.mubr.bf16.mxu0 %v1323_v1 }
 0x442   : > { %1477 = vmatmul.mubr.bf16.gmra.mxu0 %v1322_v61 }
 0x447   : > { %v1358_v13 = vpop.f32.mrf.mxu0 }
 0x449   : > { %v1360_v31 = vpop.f32.mrf.mxu0 }
 0x44b   : > { %v1361_v15 = vpop.f32.mrf.mxu0 }
 0x44c   : > { %v1485_v6 = vpack.c.bf16 %v1361_v15, %v1358_v13 }
 0x44d   : > { %v1363_v63 = vpop.f32.mrf.mxu0 }
 0x44e   : > { %2225 = vmatprep.mubr.msk.bf16.mxu1 %vm506_vm0, %v1485_v6 }
 0x451   : > { %v1366_v58 = vpop.f32.mrf.mxu0 }
 0x453   : > { %v1368_v10 = vpop.f32.mrf.mxu0 }
 0x455   : > { %v1369_v18 = vpop.f32.mrf.mxu0 }
 0x456   : > { %v1486_v49 = vpack.c.bf16 %v1369_v18, %v1366_v58 }
 0x457   : > { %v1371_v22 = vpop.f32.mrf.mxu0 }
 0x458   : > { %2226 = vmatmul.mubr.msk.bf16.vlgmr.msra.gmra.mxu1 %vm506_vm0, %v1486_v49 }
 0x459   : > { %v1374_v12 = vpop.f32.mrf.mxu0 }
 0x45b   : > { %v1376_v52 = vpop.f32.mrf.mxu0 }
 0x45d   : > { %v1377_v30 = vpop.f32.mrf.mxu0 }
 0x45e   : > { %v1487_v9 = vpack.c.bf16 %v1377_v30, %v1374_v12 }
 0x45f   : > { %v1379_v38 = vpop.f32.mrf.mxu0 }
 0x460   : > { %2229 = vmatprep.mubr.msk.bf16.mxu1 %vm506_vm0, %v1487_v9 }
 0x461   : > { %v1382_v11 = vpop.f32.mrf.mxu0 }
 0x463   : > { %v1384_v16 = vpop.f32.mrf.mxu0 }
 0x464   : > { %v1792_v16 = vld [vmem:[#allocation2 + $0xd8] sm:$0xff] }
 0x465   : > { %v1385_v4 = vpop.f32.mrf.mxu0 }
 0x466   : > { %v1488_v21 = vpack.c.bf16 %v1385_v4, %v1382_v11 }
 0x467   : > { %v1387_v54 = vpop.f32.mrf.mxu0 }
 0x468   : > { %2230 = vmatmul.mubr.msk.bf16.gmra.mxu1 %vm506_vm0, %v1488_v21  ;;  %v1790_v21 = vld [vmem:[#allocation2 + $0xb0] sm:$0xff] }
 0x469   : > { %v1390_v45 = vpop.f32.mrf.mxu0 }
 0x46b   : > { %v1392_v7 = vpop.f32.mrf.mxu0 }
 0x46c   : > { %v1793_v7 = vld [vmem:[#allocation2 + $0x18] sm:$0xff] }
 0x46d   : > { %v1393_v51 = vpop.f32.mrf.mxu0 }
 0x46e   : > { %v1489_v60 = vpack.c.bf16 %v1393_v51, %v1390_v45 }
 0x46f   : > { %v1395_v5 = vpop.f32.mrf.mxu0 }
 0x470   : > { %2233 = vmatprep.mubr.msk.bf16.mxu1 %vm506_vm0, %v1489_v60  ;;  %v1791_v5 = vld [vmem:[#allocation2] sm:$0xff] }
 0x471   : > { %v1398_v48 = vpop.f32.mrf.mxu0 }
 0x473   : > { %v1400_v8 = vpop.f32.mrf.mxu0 }
 0x475   : > { %v1401_v28 = vpop.f32.mrf.mxu0 }
 0x476   : > { %v1490_v35 = vpack.c.bf16 %v1401_v28, %v1398_v48 }
 0x477   : > { %v1403_v26 = vpop.f32.mrf.mxu0 }
 0x478   : > { %2234 = vmatmul.mubr.msk.bf16.gmra.mxu1 %vm506_vm0, %v1490_v35  ;;  %v1796_v35 = vld [vmem:[#allocation2 + $0x30] sm:$0xff] }
 0x479   : > { %v1406_v41 = vpop.f32.mrf.mxu0 }
 0x47b   : > { %v1408_v29 = vpop.f32.mrf.mxu0 }
 0x47d   : > { %v1409_v34 = vpop.f32.mrf.mxu0 }
 0x47e   : > { %v1491_v20 = vpack.c.bf16 %v1409_v34, %v1406_v41  ;;  %v1794_v41 = vld [vmem:[#allocation2 + $0x50] sm:$0xff] }
 0x47f   : > { %v1411_v47 = vpop.f32.mrf.mxu0 }
 0x480   : > { %2237 = vmatprep.mubr.msk.bf16.mxu1 %vm506_vm0, %v1491_v20  ;;  %v1797_v20 = vld [vmem:[#allocation2 + $0x48] sm:$0xff] }
 0x481   : > { %v1414_v17 = vpop.f32.mrf.mxu0 }
 0x483   : > { %v1416_v50 = vpop.f32.mrf.mxu0 }
 0x484   : > { %v1795_v50 = vld [vmem:[#allocation2 + $0x68] sm:$0xff] }
 0x485   : > { %v1417_v33 = vpop.f32.mrf.mxu0 }
 0x486   : > { %v1492_v40 = vpack.c.bf16 %v1417_v33, %v1414_v17 }
 0x487   : > { %v1419_v57 = vpop.f32.mrf.mxu0 }
 0x488   : > { %2238 = vmatmul.mubr.msk.bf16.gmra.mxu1 %vm506_vm0, %v1492_v40 }
 0x489   : > { %v1422_v36 = vpop.f32.mrf.mxu0 }
 0x48b   : > { %v1424_v42 = vpop.f32.mrf.mxu0 }
 0x48d   : > { %v1425_v32 = vpop.f32.mrf.mxu0 }
 0x48e   : > { %v1493_v2 = vpack.c.bf16 %v1425_v32, %v1422_v36  ;;  %v1800_v36 = vld [vmem:[#allocation2 + $0xe8] sm:$0xff]  ;;  %v1798_v32 = vld [vmem:[#allocation2 + $0x80] sm:$0xff] }
 0x48f   : > { %v1427_v43 = vpop.f32.mrf.mxu0 }
 0x490   : > { %2241 = vmatprep.mubr.msk.bf16.mxu1 %vm506_vm0, %v1493_v2 }
 0x491   : > { %v1430_v44 = vpop.f32.mrf.mxu0 }
 0x493   : > { %v1432_v25 = vpop.f32.mrf.mxu0 }
 0x495   : > { %v1433_v46 = vpop.f32.mrf.mxu0 }
 0x496   : > { %v1494_v53 = vpack.c.bf16 %v1433_v46, %v1430_v44  ;;  %v1801_v44 = vld [vmem:[#allocation2 + $0xb8] sm:$0xff] }
 0x497   : > { %v1435_v37 = vpop.f32.mrf.mxu0 }
 0x498   : > { %2242 = vmatmul.mubr.msk.bf16.gmra.mxu1 %vm506_vm0, %v1494_v53  ;;  %v1799_v53 = vld [vmem:[#allocation2 + $0x88] sm:$0xff] }
 0x499   : > { %v1438_v55 = vpop.f32.mrf.mxu0 }
 0x49b   : > { %v1440_v59 = vpop.f32.mrf.mxu0 }
 0x49d   : > { %v1441_v3 = vpop.f32.mrf.mxu0 }
 0x49e   : > { %v1495_v14 = vpack.c.bf16 %v1441_v3, %v1438_v55  ;;  %v1804_v3 = vld [vmem:[#allocation2 + $0x8] sm:$0xff] }
 0x49f   : > { %v1443_v24 = vpop.f32.mrf.mxu0 }
 0x4a0   : > { %2245 = vmatprep.mubr.msk.bf16.mxu1 %vm506_vm0, %v1495_v14  ;;  %v1802_v24 = vld [vmem:[#allocation2 + $0x60] sm:$0xff] }
 0x4a1   : > { %v1446_v19 = vpop.f32.mrf.mxu0 }
 0x4a3   : > { %v1448_v39 = vpop.f32.mrf.mxu0 }
 0x4a5   : > { %v1449_v0 = vpop.f32.mrf.mxu0 }
 0x4a6   : > { %v1496_v27 = vpack.c.bf16 %v1449_v0, %v1446_v19  ;;  %v1805_v0 = vld [vmem:[#allocation2 + $0x78] sm:$0xff] }
 0x4a7   : > { %v1451_v23 = vpop.f32.mrf.mxu0 }
 0x4a8   : > { %2246 = vmatmul.mubr.msk.bf16.gmra.mxu1 %vm506_vm0, %v1496_v27 }
 0x4ea   : > { %v1454_v56 = vpop.f32.mrf.mxu0 }
 0x4ec   : > { %v1456_v62 = vpop.f32.mrf.mxu0 }
 0x4ee   : > { %v1457_v1 = vpop.f32.mrf.mxu0 }
 0x4ef   : > { %v1497_v61 = vpack.c.bf16 %v1457_v1, %v1454_v56  ;;  %v1803_v56 = vld [vmem:[#allocation2 + $0xf0] sm:$0xff] }
 0x4f0   : > { %v1459_v13 = vpop.f32.mrf.mxu0 }
 0x4f1   : > { %2249 = vmatprep.mubr.msk.bf16.mxu1 %vm506_vm0, %v1497_v61  ;;  %v1808_v13 = vld [vmem:[#allocation2 + $0x40] sm:$0xff] }
 0x4f2   : > { %v1462_v31 = vpop.f32.mrf.mxu0 }
 0x4f4   : > { %v1464_v15 = vpop.f32.mrf.mxu0 }
 0x4f5   : > { %v1806_v15 = vld [vmem:[#allocation2 + $0x38] sm:$0xff] }
 0x4f6   : > { %v1465_v6 = vpop.f32.mrf.mxu0 }
 0x4f7   : > { %v1498_v63 = vpack.c.bf16 %v1465_v6, %v1462_v31 }
 0x4f8   : > { %v1467_v58 = vpop.f32.mrf.mxu0 }
 0x4f9   : > { %2250 = vmatmul.mubr.msk.bf16.gmra.mxu1 %vm506_vm0, %v1498_v63  ;;  %v1809_v58 = vld [vmem:[#allocation2 + $0xc8] sm:$0xff] }
 0x4fa   : > { %v1470_v10 = vpop.f32.mrf.mxu0 }
 0x4fc   : > { %v1472_v18 = vpop.f32.mrf.mxu0 }
 0x4fe   : > { %v1473_v49 = vpop.f32.mrf.mxu0 }
 0x4ff   : > { %v1499_v22 = vpack.c.bf16 %v1473_v49, %v1470_v10  ;;  %v1807_v49 = vld [vmem:[#allocation2 + $0x58] sm:$0xff] }
 0x500   : > { %v1475_v12 = vpop.f32.mrf.mxu0 }
 0x501   : > { %2253 = vmatprep.mubr.msk.bf16.mxu1 %vm506_vm0, %v1499_v22 }
 0x502   : > { %v1478_v52 = vpop.f32.mrf.mxu0 }
 0x504   : > { %v1480_v30 = vpop.f32.mrf.mxu0 }
 0x505   : > { %v1812_v30 = vld [vmem:[#allocation2 + $0x70] sm:$0xff] }
 0x506   : > { %v1481_v9 = vpop.f32.mrf.mxu0 }
 0x507   : > { %v1500_v38 = vpack.c.bf16 %v1481_v9, %v1478_v52 }
 0x508   : > { %v1483_v11 = vpop.f32.mrf.mxu0 }
 0x509   : > { %2254 = vmatmul.mubr.msk.bf16.gmra.mxu1 %vm506_vm0, %v1500_v38  ;;  %v1810_v38 = vld [vmem:[#allocation2 + $0xe0] sm:$0xff] }
 0x518   : > { %v2227_v4 = vpop.f32.mrf.mxu1 }
 0x519   : > { %v1824_v54 = vadd.f32 %v2227_v4, %v1792_v16  ;;  %v1813_v4 = vld [vmem:[#allocation2 + $0xc0] sm:$0xff] }
 0x51a   : > { %v1663_v45 = vpop.f32.mrf.mxu1 }
 0x51b   : > { %1856 = vst [vmem:[#allocation2 + $0xd8] sm:$0xff] %v1824_v54  ;;  %v1822_v51 = vadd.f32 %v1790_v21, %v1663_v45  ;;  %v1811_v45 = vld [vmem:[#allocation2 + $0x90] sm:$0xff] }
 0x51c   : > { %v2228_v60 = vpop.f32.mrf.mxu1 }
 0x51d   : > { %1854 = vst [vmem:[#allocation2 + $0xb0] sm:$0xff] %v1822_v51  ;;  %v1825_v48 = vadd.f32 %v2228_v60, %v1793_v7 }
 0x51e   : > { %v1666_v8 = vpop.f32.mrf.mxu1 }
 0x51f   : > { %1857 = vst [vmem:[#allocation2 + $0x18] sm:$0xff] %v1825_v48  ;;  %v1823_v28 = vadd.f32 %v1791_v5, %v1666_v8  ;;  %v1816_v5 = vld [vmem:[#allocation2 + $0x10] sm:$0xff]  ;;  %v1814_v8 = vld [vmem:[#allocation2 + $0xa8] sm:$0xff] }
 0x521   : > { %1855 = vst [vmem:[#allocation2] sm:$0xff] %v1823_v28 }
 0x528   : > { %v2231_v26 = vpop.f32.mrf.mxu1 }
 0x529   : > { %v1828_v29 = vadd.f32 %v2231_v26, %v1796_v35  ;;  %v1817_v26 = vld [vmem:[#allocation2 + $0x28] sm:$0xff] }
 0x52a   : > { %v1679_v34 = vpop.f32.mrf.mxu1 }
 0x52b   : > { %1860 = vst [vmem:[#allocation2 + $0x30] sm:$0xff] %v1828_v29  ;;  %v1826_v47 = vadd.f32 %v1794_v41, %v1679_v34  ;;  %v1815_v34 = vld [vmem:[#allocation2 + $0xd0] sm:$0xff] }
 0x52c   : > { %v2232_v17 = vpop.f32.mrf.mxu1 }
 0x52d   : > { %1858 = vst [vmem:[#allocation2 + $0x50] sm:$0xff] %v1826_v47  ;;  %v1829_v33 = vadd.f32 %v2232_v17, %v1797_v20 }
 0x52e   : > { %v1682_v40 = vpop.f32.mrf.mxu1 }
 0x52f   : > { %1861 = vst [vmem:[#allocation2 + $0x48] sm:$0xff] %v1829_v33  ;;  %v1827_v57 = vadd.f32 %v1795_v50, %v1682_v40  ;;  %v1820_v50 = vld [vmem:[#allocation2 + $0x20] sm:$0xff] }
 0x530   : > { %v1818_v40 = vld [vmem:[#allocation2 + $0xa0] sm:$0xff] }
 0x531   : > { %1859 = vst [vmem:[#allocation2 + $0x68] sm:$0xff] %v1827_v57 }
 0x538   : > { %v2235_v42 = vpop.f32.mrf.mxu1 }
 0x539   : > { %v1832_v2 = vadd.f32 %v2235_v42, %v1800_v36  ;;  %v1821_v42 = vld [vmem:[#allocation2 + $0x98] sm:$0xff] }
 0x53a   : > { %v1695_v43 = vpop.f32.mrf.mxu1 }
 0x53b   : > { %1864 = vst [vmem:[#allocation2 + $0xe8] sm:$0xff] %v1832_v2  ;;  %v1830_v25 = vadd.f32 %v1798_v32, %v1695_v43  ;;  %v1819_v43 = vld [vmem:[#allocation2 + $0xf8] sm:$0xff] }
 0x53c   : > { %v2236_v46 = vpop.f32.mrf.mxu1 }
 0x53d   : > { %1862 = vst [vmem:[#allocation2 + $0x80] sm:$0xff] %v1830_v25  ;;  %v1833_v37 = vadd.f32 %v2236_v46, %v1801_v44 }
 0x53e   : > { %v1698_v55 = vpop.f32.mrf.mxu1 }
 0x53f   : > { %1865 = vst [vmem:[#allocation2 + $0xb8] sm:$0xff] %v1833_v37  ;;  %v1831_v59 = vadd.f32 %v1799_v53, %v1698_v55 }
 0x541   : > { %1863 = vst [vmem:[#allocation2 + $0x88] sm:$0xff] %v1831_v59 }
 0x548   : > { %v2239_v14 = vpop.f32.mrf.mxu1 }
 0x549   : > { %v1836_v19 = vadd.f32 %v2239_v14, %v1804_v3 }
 0x54a   : > { %v1711_v39 = vpop.f32.mrf.mxu1 }
 0x54b   : > { %1868 = vst [vmem:[#allocation2 + $0x8] sm:$0xff] %v1836_v19  ;;  %v1834_v27 = vadd.f32 %v1802_v24, %v1711_v39 }
 0x54c   : > { %v2240_v23 = vpop.f32.mrf.mxu1 }
 0x54d   : > { %1866 = vst [vmem:[#allocation2 + $0x60] sm:$0xff] %v1834_v27  ;;  %v1837_v62 = vadd.f32 %v2240_v23, %v1805_v0 }
 0x54e   : > { %v1714_v1 = vpop.f32.mrf.mxu1 }
 0x54f   : > { %1869 = vst [vmem:[#allocation2 + $0x78] sm:$0xff] %v1837_v62  ;;  %v1835_v61 = vadd.f32 %v1803_v56, %v1714_v1 }
 0x551   : > { %1867 = vst [vmem:[#allocation2 + $0xf0] sm:$0xff] %v1835_v61 }
 0x558   : > { %v2243_v31 = vpop.f32.mrf.mxu1 }
 0x559   : > { %v1840_v6 = vadd.f32 %v2243_v31, %v1808_v13 }
 0x55a   : > { %v1727_v63 = vpop.f32.mrf.mxu1 }
 0x55b   : > { %1872 = vst [vmem:[#allocation2 + $0x40] sm:$0xff] %v1840_v6  ;;  %v1838_v10 = vadd.f32 %v1806_v15, %v1727_v63 }
 0x55c   : > { %v2244_v18 = vpop.f32.mrf.mxu1 }
 0x55d   : > { %1870 = vst [vmem:[#allocation2 + $0x38] sm:$0xff] %v1838_v10  ;;  %v1841_v22 = vadd.f32 %v2244_v18, %v1809_v58 }
 0x55e   : > { %v1730_v12 = vpop.f32.mrf.mxu1 }
 0x55f   : > { %1873 = vst [vmem:[#allocation2 + $0xc8] sm:$0xff] %v1841_v22  ;;  %v1839_v52 = vadd.f32 %v1807_v49, %v1730_v12 }
 0x561   : > { %1871 = vst [vmem:[#allocation2 + $0x58] sm:$0xff] %v1839_v52 }
 0x568   : > { %v2247_v9 = vpop.f32.mrf.mxu1 }
 0x569   : > { %v1844_v11 = vadd.f32 %v2247_v9, %v1812_v30 }
 0x56a   : > { %v1743_v16 = vpop.f32.mrf.mxu1 }
 0x56b   : > { %1876 = vst [vmem:[#allocation2 + $0x70] sm:$0xff] %v1844_v11  ;;  %v1842_v21 = vadd.f32 %v1810_v38, %v1743_v16 }
 0x56c   : > { %v2248_v54 = vpop.f32.mrf.mxu1 }
 0x56d   : > { %1874 = vst [vmem:[#allocation2 + $0xe0] sm:$0xff] %v1842_v21  ;;  %v1845_v7 = vadd.f32 %v2248_v54, %v1813_v4 }
 0x56e   : > { %v1746_v51 = vpop.f32.mrf.mxu1 }
 0x56f   : > { %1877 = vst [vmem:[#allocation2 + $0xc0] sm:$0xff] %v1845_v7  ;;  %v1843_v60 = vadd.f32 %v1811_v45, %v1746_v51 }
 0x571   : > { %1875 = vst [vmem:[#allocation2 + $0x90] sm:$0xff] %v1843_v60 }
 0x5b9   : > { %v2251_v48 = vpop.f32.mrf.mxu1 }
 0x5ba   : > { %v1848_v28 = vadd.f32 %v2251_v48, %v1816_v5 }
 0x5bb   : > { %v1759_v35 = vpop.f32.mrf.mxu1 }
 0x5bc   : > { %1880 = vst [vmem:[#allocation2 + $0x10] sm:$0xff] %v1848_v28  ;;  %v1846_v41 = vadd.f32 %v1814_v8, %v1759_v35 }
 0x5bd   : > { %v2252_v29 = vpop.f32.mrf.mxu1 }
 0x5be   : > { %1878 = vst [vmem:[#allocation2 + $0xa8] sm:$0xff] %v1846_v41  ;;  %v1849_v20 = vadd.f32 %v2252_v29, %v1817_v26 }
 0x5bf   : > { %v1762_v47 = vpop.f32.mrf.mxu1 }
 0x5c0   : > { %1881 = vst [vmem:[#allocation2 + $0x28] sm:$0xff] %v1849_v20  ;;  %v1847_v17 = vadd.f32 %v1815_v34, %v1762_v47 }
 0x5c2   : > { %1879 = vst [vmem:[#allocation2 + $0xd0] sm:$0xff] %v1847_v17 }
 0x5c9   : > { %v2255_v33 = vpop.f32.mrf.mxu1 }
 0x5ca   : > { %v1852_v57 = vadd.f32 %v2255_v33, %v1820_v50 }
 0x5cb   : > { %v1775_v36 = vpop.f32.mrf.mxu1 }
 0x5cc   : > { %1884 = vst [vmem:[#allocation2 + $0x20] sm:$0xff] %v1852_v57  ;;  %v1850_v32 = vadd.f32 %v1818_v40, %v1775_v36 }
 0x5cd   : > { %v2256_v2 = vpop.f32.mrf.mxu1 }
 0x5ce   : > { %1882 = vst [vmem:[#allocation2 + $0xa0] sm:$0xff] %v1850_v32  ;;  %v1853_v44 = vadd.f32 %v2256_v2, %v1821_v42  ;;  %1889 = sbr.rel (%p2175_p1) target bundleno = 1510 (0x5e6), region = 44 }
 0x5cf   : > { %v1778_v25 = vpop.f32.mrf.mxu1 }
 0x5d0   : > { %1885 = vst [vmem:[#allocation2 + $0x98] sm:$0xff] %v1853_v44  ;;  %v1851_v46 = vadd.f32 %v1819_v43, %v1778_v25 }
 0x5d2   : > { %1883 = vst [vmem:[#allocation2 + $0xf8] sm:$0xff] %v1851_v46 }
 0x5d3   : > { %v1890_v53 = vld [vmem:[#allocation2 + $0xb0] sm:$0xff]  ;;  %v3405_v37 = vld [vmem:[%s3536_s3] ss:$0 sm:$0xff]  ;;  %v1892_v14 = vld [vmem:[#allocation2 + $0xd8] sm:$0xff] }
 0x5d4   : > { %v1891_v55 = vld [vmem:[#allocation2] sm:$0xff]  ;;  %v1929_v59 = vadd.f32 %v3405_v37, %v1890_v53  ;;  %v1893_v24 = vld [vmem:[#allocation2 + $0x18] sm:$0xff]  ;;  %v1894_v19 = vld [vmem:[#allocation2 + $0x50] sm:$0xff]  ;;  %v1931_v39 = vadd.f32 %v3405_v37, %v1892_v14 }
 0x5d5   : > { %v1930_v3 = vadd.f32 %v3405_v37, %v1891_v55  ;;  %v1932_v0 = vadd.f32 %v3405_v37, %v1893_v24  ;;  %v1933_v27 = vadd.f32 %v3405_v37, %v1894_v19  ;;  %v1895_v23 = vld [vmem:[#allocation2 + $0x68] sm:$0xff]  ;;  %v1896_v56 = vld [vmem:[#allocation2 + $0x30] sm:$0xff]  ;;  %v1898_v31 = vld [vmem:[#allocation2 + $0x80] sm:$0xff] }
 0x5d6   : > { %v1897_v62 = vld [vmem:[#allocation2 + $0x48] sm:$0xff]  ;;  %1961 = vst [vmem:[%s2783_s21] sm:$0xff] %v1929_v59  ;;  %v1934_v1 = vadd.f32 %v3405_v37, %v1895_v23  ;;  %v1935_v61 = vadd.f32 %v3405_v37, %v1896_v56  ;;  %1963 = vst [vmem:[%s2783_s21 + $0x10] sm:$0xff] %v1931_v39  ;;  %v1937_v63 = vadd.f32 %v3405_v37, %v1898_v31  ;;  %v1901_v18 = vld [vmem:[#allocation2 + $0xb8] sm:$0xff] }
 0x5d7   : > { %1962 = vst [vmem:[%s2783_s21 + $0x8] sm:$0xff] %v1930_v3  ;;  %v1936_v13 = vadd.f32 %v3405_v37, %v1897_v62  ;;  %v1899_v15 = vld [vmem:[#allocation2 + $0x88] sm:$0xff]  ;;  %1964 = vst [vmem:[%s2783_s21 + $0x18] sm:$0xff] %v1932_v0  ;;  %v1902_v49 = vld [vmem:[#allocation2 + $0x60] sm:$0xff]  ;;  %v1940_v12 = vadd.f32 %v3405_v37, %v1901_v18 }
 0x5d8   : > { %v1900_v6 = vld [vmem:[#allocation2 + $0xe8] sm:$0xff]  ;;  %1965 = vst [vmem:[%s2783_s21 + $0x20] sm:$0xff] %v1933_v27  ;;  %v1938_v58 = vadd.f32 %v3405_v37, %v1899_v15  ;;  %v1903_v22 = vld [vmem:[#allocation2 + $0xf0] sm:$0xff]  ;;  %1966 = vst [vmem:[%s2783_s21 + $0x28] sm:$0xff] %v1934_v1  ;;  %v1941_v52 = vadd.f32 %v3405_v37, %v1902_v49 }
 0x5d9   : > { %v1939_v10 = vadd.f32 %v3405_v37, %v1900_v6  ;;  %1967 = vst [vmem:[%s2783_s21 + $0x30] sm:$0xff] %v1935_v61  ;;  %1968 = vst [vmem:[%s2783_s21 + $0x38] sm:$0xff] %v1936_v13  ;;  %v1942_v30 = vadd.f32 %v3405_v37, %v1903_v22  ;;  %v1904_v9 = vld [vmem:[#allocation2 + $0x8] sm:$0xff]  ;;  %v1905_v38 = vld [vmem:[#allocation2 + $0x78] sm:$0xff] }
 0x5da   : > { %v1906_v11 = vld [vmem:[#allocation2 + $0x38] sm:$0xff]  ;;  %1969 = vst [vmem:[%s2783_s21 + $0x40] sm:$0xff] %v1937_v63  ;;  %1970 = vst [vmem:[%s2783_s21 + $0x48] sm:$0xff] %v1938_v58  ;;  %v1943_v16 = vadd.f32 %v3405_v37, %v1904_v9  ;;  %v1944_v4 = vadd.f32 %v3405_v37, %v1905_v38  ;;  %v1908_v45 = vld [vmem:[#allocation2 + $0x40] sm:$0xff] }
 0x5db   : > { %1971 = vst [vmem:[%s2783_s21 + $0x50] sm:$0xff] %v1939_v10  ;;  %v1945_v21 = vadd.f32 %v3405_v37, %v1906_v11  ;;  %v1907_v54 = vld [vmem:[#allocation2 + $0x58] sm:$0xff]  ;;  %v1909_v7 = vld [vmem:[#allocation2 + $0xc8] sm:$0xff]  ;;  %1972 = vst [vmem:[%s2783_s21 + $0x58] sm:$0xff] %v1940_v12  ;;  %v1947_v60 = vadd.f32 %v3405_v37, %v1908_v45 }
 0x5dc   : > { %1973 = vst [vmem:[%s2783_s21 + $0x60] sm:$0xff] %v1941_v52  ;;  %1974 = vst [vmem:[%s2783_s21 + $0x68] sm:$0xff] %v1942_v30  ;;  %v1946_v51 = vadd.f32 %v3405_v37, %v1907_v54  ;;  %v1948_v5 = vadd.f32 %v3405_v37, %v1909_v7  ;;  %v1910_v48 = vld [vmem:[#allocation2 + $0xe0] sm:$0xff]  ;;  %v1911_v8 = vld [vmem:[#allocation2 + $0x90] sm:$0xff] }
 0x5dd   : > { %v1912_v28 = vld [vmem:[#allocation2 + $0x70] sm:$0xff]  ;;  %1975 = vst [vmem:[%s2783_s21 + $0x70] sm:$0xff] %v1943_v16  ;;  %1976 = vst [vmem:[%s2783_s21 + $0x78] sm:$0xff] %v1944_v4  ;;  %v1949_v35 = vadd.f32 %v3405_v37, %v1910_v48  ;;  %v1950_v26 = vadd.f32 %v3405_v37, %v1911_v8  ;;  %v1913_v29 = vld [vmem:[#allocation2 + $0xc0] sm:$0xff] }
 0x5de   : > { %1977 = vst [vmem:[%s2783_s21 + $0x80] sm:$0xff] %v1945_v21  ;;  %v1951_v41 = vadd.f32 %v3405_v37, %v1912_v28  ;;  %v1914_v34 = vld [vmem:[#allocation2 + $0xa8] sm:$0xff]  ;;  %v1915_v20 = vld [vmem:[#allocation2 + $0xd0] sm:$0xff]  ;;  %1978 = vst [vmem:[%s2783_s21 + $0x88] sm:$0xff] %v1946_v51  ;;  %v1952_v47 = vadd.f32 %v3405_v37, %v1913_v29 }
 0x5df   : > { %1979 = vst [vmem:[%s2783_s21 + $0x90] sm:$0xff] %v1947_v60  ;;  %1980 = vst [vmem:[%s2783_s21 + $0x98] sm:$0xff] %v1948_v5  ;;  %v1953_v17 = vadd.f32 %v3405_v37, %v1914_v34  ;;  %v1954_v50 = vadd.f32 %v3405_v37, %v1915_v20  ;;  %v1916_v33 = vld [vmem:[#allocation2 + $0x10] sm:$0xff]  ;;  %v1917_v40 = vld [vmem:[#allocation2 + $0x28] sm:$0xff] }
 0x5e0   : > { %v1918_v57 = vld [vmem:[#allocation2 + $0xa0] sm:$0xff]  ;;  %1981 = vst [vmem:[%s2783_s21 + $0xa0] sm:$0xff] %v1949_v35  ;;  %1982 = vst [vmem:[%s2783_s21 + $0xa8] sm:$0xff] %v1950_v26  ;;  %v1955_v36 = vadd.f32 %v3405_v37, %v1916_v33  ;;  %v1956_v42 = vadd.f32 %v3405_v37, %v1917_v40  ;;  %v1919_v2 = vld [vmem:[#allocation2 + $0xf8] sm:$0xff] }
 0x5e1   : > { %1983 = vst [vmem:[%s2783_s21 + $0xb0] sm:$0xff] %v1951_v41  ;;  %v1957_v32 = vadd.f32 %v3405_v37, %v1918_v57  ;;  %v1920_v43 = vld [vmem:[#allocation2 + $0x20] sm:$0xff]  ;;  %v1921_v44 = vld [vmem:[#allocation2 + $0x98] sm:$0xff]  ;;  %1984 = vst [vmem:[%s2783_s21 + $0xb8] sm:$0xff] %v1952_v47  ;;  %v1958_v25 = vadd.f32 %v3405_v37, %v1919_v2 }
 0x5e2   : > { %1985 = vst [vmem:[%s2783_s21 + $0xc0] sm:$0xff] %v1953_v17  ;;  %1986 = vst [vmem:[%s2783_s21 + $0xc8] sm:$0xff] %v1954_v50  ;;  %v1959_v46 = vadd.f32 %v3405_v37, %v1920_v43  ;;  %v1960_v53 = vadd.f32 %v3405_v37, %v1921_v44 }
 0x5e3   : > { %1987 = vst [vmem:[%s2783_s21 + $0xd0] sm:$0xff] %v1955_v36  ;;  %1988 = vst [vmem:[%s2783_s21 + $0xd8] sm:$0xff] %v1956_v42 }
 0x5e4   : > { %1989 = vst [vmem:[%s2783_s21 + $0xe0] sm:$0xff] %v1957_v32  ;;  %1990 = vst [vmem:[%s2783_s21 + $0xe8] sm:$0xff] %v1958_v25 }
 0x5e5   : > { %1991 = vst [vmem:[%s2783_s21 + $0xf0] sm:$0xff] %v1959_v46  ;;  %1992 = vst [vmem:[%s2783_s21 + $0xf8] sm:$0xff] %v1960_v53 }
 0x5e6 PF: > { %s2184_s18 = sshll.u32 %s2648_s19, 12  ;;  %s2007_s9 = sshll.u32 %s2783_s21, 4  ;;  %s3478_s9 = int_to_ptr.vmem [resolvable:$true] %s2007_s9 }
 0x5e7   : > { %s3475_s8 = scalar_lea.hbm %s3537_s4, %s2184_s18  ;;  %s3591_s10 = sand.u32 1, %s2636_s16  }
 0x5e8   : > { %s3482_s11 = scalar_lea.sflag [#allocation4], %s3591_s10  ;;  %s2568_s12 = scalar_lea.vmem %s3478_s9, 4096 }
 0x5e9   : > { %p2569_p2 = scmp.ne.s32.totalorder %s3478_s9, %s2568_s12  ;;  %s2664_s19 = smov [#allocation3]  }
 0x5ea   : > { %s2572_s13 = sshll.u32 %s2664_s19, 4  ;;  %s2573_s13 = int_to_ptr.vmem [resolvable:$false] %s2572_s13 }
 0x5eb   : > { %p2570_p4 = pnand %p2569_p2, %p2741_p3  ;;  %s2574_s14 = scalar_lea.vmem %s2573_s13, 8192 }
 0x5ec   : > { %p2575_p6 = scmp.lt.s32.totalorder %s3478_s9, %s2573_s13  ;;  %p2576_p7 = scmp.lt.s32.totalorder %s2574_s14, %s2568_s12 }
 0x5ed   : > { %p2571_p5 = pneg %p2570_p4 }
 0x5ee   : > { %p2577_p8 = por %p2576_p7, %p2575_p6 }
 0x5f0   : > { %p2578_p10 = pnand %p2577_p8, %p2571_p5 }
 0x5f2   : > { %2581 = shalt.err (!%p2578_p10)
}
 0x5f3   : > { %s2582_s21 = scalar_lea.hbm %s3475_s8, 4096  ;;  %s2586_s29 = scalar_lea.hbm %s3537_s4, 8192 }
 0x5f4   : > { %p2583_p11 = scmp.ne.s32.totalorder %s3475_s8, %s2582_s21  ;;  %p2587_p0 = scmp.lt.s32.totalorder %s3475_s8, %s3537_s4 }
 0x5f5   : > { %p2588_p1 = scmp.lt.s32.totalorder %s2586_s29, %s2582_s21 }
 0x5f6   : > { %p2584_p12 = pnand %p2583_p11, %p2741_p3 }
 0x5f7   : > { %p2589_p2 = por %p2588_p1, %p2587_p0 }
 0x5f8   : > { %p2585_p13 = pneg %p2584_p12 }
 0x5fa   : > { %p2590_p4 = pnand %p2589_p2, %p2585_p13 }
 0x5fc   : > { %2593 = shalt.err (!%p2590_p4)
}
 0x5fd   : > { %s2665_s26 = smov 128   ;;  %s2666_s18 = smov 8  }
 0x5fe   : > { %2266 = dma.vmem_to_hbm [thread:$0]  (%p2741_p3), %s3478_s9, 4096, %s3475_s8, %s3482_s11, %s2665_s26, %s2665_s26, %s2666_s18  }
 0x5ff PF: > { %p2272_p5 = scmp.ge.s32.totalorder %s2660_s22, 2  ;;  %s2022_s6 = sand.u32 1, %s2632_s15  }
 0x600   : > { %s2023_s7 = scalar_lea.sflag [#allocation4], %s2022_s6 }
 0x601   : > { %p2269_p6 = pnand %p2272_p5, %p2751_p9 }
 0x603   : > { %p2270_p7 = pneg %p2269_p6 }
 0x605   : > { %2627 = dma.done.wait (%p2270_p7), %s2023_s7, 4096  }
 0x606   : > { %2629 = vsyncadd (%p2270_p7), %s2023_s7, 4294963200  ;;  %s17_s22 = sadd.s32 1, %s2660_s22   ;;  %s3592_s19 = sld [smem:[#allocation6_spill]] }
 0x607   : > { %p14_p8 = scmp.ge.s32.totalorder %s17_s22, 18   ;;  %s3593_s27 = sld [smem:[#allocation7_spill]] }
 0x608   : > { %s3594_s21 = sld [smem:[#allocation8_spill]]  ;;  %s3595_s15 = smov %s2636_s16 }
 0x609   : > { %s3596_s16 = smov %s2640_s17  ;;  %s3597_s17 = smov %s2759_s5 }
 0x60a   : > { %s3598_s18 = smov %s2652_s20  ;;  %16 = sbr.rel (!%p14_p8) target bundleno = 5 (0x5), region = 85 }
 0x60d   : > { %s3599_s20 = smov %s3593_s27 }
 0x60f   :  { %2028 = vsyncpa [#allocation4], 1 }
 0x610   :  { %2030 = vsyncpa [#allocation4 + $0x1], 1 }

</bundles_post_ra>
